<compile_context>
chip_gen: v7x
topology: tpu7x:2x2x1
jax: 0.10.0
libtpu: 0.0.40
codegen_flags: <defaults>
</compile_context>

<pallas_src>
import functools

import jax
import jax.numpy as jnp
from jax import lax
from jax.experimental import pallas as pl
from jax.experimental.pallas import tpu as pltpu

EPS = 1e-5


# ----------------------------- Pallas kernel ------------------------------ #
def _residual_group_kernel(x_ref, w_ref, b_ref, o_ref, hp_ref, *,
                           n_layers, n_rows):
    """All layers of one ResidualGroup for one image, fully VMEM-resident.

    x_ref : (1, H, W*C)        packed input image (lane-dense), f32
    w_ref : (L, 3, W*C, W*C)   banded per-dy conv matrices, bf16
    b_ref : (L, 1, W*C)        packed per-layer bias, f32
    o_ref : (1, H, W*C)        packed output
    hp_ref: (H+2, W*C) f32     persistent VMEM scratch: row-padded activation
    """
    H = n_rows
    WC = hp_ref.shape[1]

    # Zero only the two halo rows of the persistent scratch (once per step).
    hp_ref[pl.ds(0, 1), :] = jnp.zeros((1, WC), hp_ref.dtype)
    hp_ref[pl.ds(H + 1, 1), :] = jnp.zeros((1, WC), hp_ref.dtype)

    x0 = x_ref[0].astype(jnp.float32)                    # (H, W*C)

    def conv_layer(h, l):
        # Write interior rows; halo rows stay zero => zero row padding.
        hp_ref[pl.ds(1, H), :] = h
        acc = b_ref[l].astype(jnp.float32)               # (1, W*C), broadcasts
        for dy in range(3):                              # 3 banded MXU matmuls
            acc = acc + jnp.dot(
                hp_ref[pl.ds(dy, H), :].astype(jnp.bfloat16),   # x[h+dy-1]
                w_ref[l, dy],                                    # bf16
                preferred_element_type=jnp.float32)
        return acc                                        # (H, W*C) f32

    h = x0
    for l in range(n_layers - 1):                         # RepVGG blocks
        h = jnp.maximum(conv_layer(h, l), 0.0)
    y = conv_layer(h, n_layers - 1) + x0                  # trailing conv + skip
    o_ref[0] = y.astype(o_ref.dtype)


# ------------------- host-side packing of fused weights ------------------- #
def _pack_conv_weights(layer_w, W):
    """(L,3,3,Cin,Cout) HWIO -> (L, 3, W*Cin, W*Cout) banded matrices.

    Wp[l, dy, p*Cin+ci, w*Cout+co] = layer_w[l, dy, p-w+1, ci, co] for |p-w|<=1
    (else 0).  With activations packed as (H, W*C):
        y_row[h] = sum_dy  x_row[h+dy-1] @ Wp[l, dy]     (rows zero-padded).
    The image's left/right zero-pad columns are dropped, so K == W*Cin exactly.
    """
    L, _, _, Cin, Cout = layer_w.shape
    p = jnp.arange(W)[:, None]                           # input pixel
    w = jnp.arange(W)[None, :]                           # output pixel
    d = p - w + 1                                        # kernel dx index
    blocks = layer_w[:, :, jnp.clip(d, 0, 2)]            # (L,3,W,W,Cin,Cout)
    mask = ((d >= 0) & (d <= 2))[None, None, :, :, None, None]
    blocks = jnp.where(mask, blocks, 0.0)
    blocks = blocks.transpose(0, 1, 2, 4, 3, 5)          # (L,3,W,Cin,W,Cout)
    return blocks.reshape(L, 3, W * Cin, W * Cout)


def residual_group_pallas(x_nhwc, layer_w, layer_b):
    """x_nhwc: (N,H,W,C); layer_w: (L,3,3,C,C) fused HWIO; layer_b: (L,C)."""
    N, H, W, C = x_nhwc.shape
    L = layer_w.shape[0]
    WC = W * C
    assert WC % 128 == 0, "packed lane axis must be a multiple of 128"

    w_pack = _pack_conv_weights(layer_w, W).astype(jnp.bfloat16)  # (L,3,WC,WC)
    b_pack = jnp.tile(layer_b, (1, W)).reshape(L, 1, WC)          # f32
    x_pack = x_nhwc.reshape(N, H, WC)                             # lane-dense

    kernel = functools.partial(_residual_group_kernel, n_layers=L, n_rows=H)

    def call(single_buffer_invariants):
        # Grid-invariant operands: request single buffering (no point
        # double-buffering a constant-index_map slab).
        inv = ({"pipeline_mode": pl.Buffered(1)}
               if single_buffer_invariants else {})
        return pl.pallas_call(
            kernel,
            out_shape=jax.ShapeDtypeStruct((N, H, WC), x_nhwc.dtype),
            grid=(N,),
            in_specs=[
                pl.BlockSpec((1, H, WC), lambda n: (n, 0, 0)),
                pl.BlockSpec((L, 3, WC, WC), lambda n: (0, 0, 0, 0), **inv),
                pl.BlockSpec((L, 1, WC), lambda n: (0, 0, 0), **inv),
            ],
            out_specs=pl.BlockSpec((1, H, WC), lambda n: (n, 0, 0)),
            scratch_shapes=[pltpu.VMEM((H + 2, WC), jnp.float32)],
            compiler_params=pltpu.CompilerParams(
                dimension_semantics=("parallel",),
                vmem_limit_bytes=48 * 1024 * 1024),
        )(x_pack, w_pack, b_pack)

    try:
        out = call(True)
    except Exception:
        # Fallback for JAX builds that reject pl.Buffered(1) on pallas_call.
        out = call(False)
    return out.reshape(N, H, W, C)


# -------------------- parameter init + BN folding (glue) ------------------- #
def make_bn_params(key, c):
    k1, k2, k3, k4 = jax.random.split(key, 4)
    gamma = 0.5 + jax.random.uniform(k1, (c,), jnp.float32)
    beta = 0.1 * jax.random.normal(k2, (c,), jnp.float32)
    mean = 0.1 * jax.random.normal(k3, (c,), jnp.float32)
    var = 0.5 + jax.random.uniform(k4, (c,), jnp.float32)
    return gamma, beta, mean, var


def fold_bn(gamma, beta, mean, var):
    scale = gamma / jnp.sqrt(var + EPS)
    return scale, beta - mean * scale


def make_repvgg_block_params(key, c):
    kw3, kw1, kb3, kb1, kbi = jax.random.split(key, 5)
    return dict(
        w3=0.1 * jax.random.normal(kw3, (3, 3, c, c), jnp.float32),   # HWIO
        w1=0.1 * jax.random.normal(kw1, (1, 1, c, c), jnp.float32),   # HWIO
        bn3=make_bn_params(kb3, c),
        bn1=make_bn_params(kb1, c),
        bni=make_bn_params(kbi, c),
    )


def fuse_repvgg_block(p, c):
    """Fold 3 branches (conv3x3+BN, conv1x1+BN, identity BN) into one 3x3.

    Identity fold uses eye(c): valid because RepVGGBlock only has the identity
    branch when in_channels == out_channels (as in this module).
    """
    s3, b3 = fold_bn(*p["bn3"])
    s1, b1 = fold_bn(*p["bn1"])
    si, bi = fold_bn(*p["bni"])
    k = p["w3"] * s3[None, None, None, :]
    center = (p["w1"][0, 0] * s1[None, :]
              + jnp.eye(c, dtype=jnp.float32) * si[None, :])
    k = k.at[1, 1].add(center)
    return k, b3 + b1 + bi


# ------------------------ pure-JAX reference (unfused) --------------------- #
def _conv_ref(x, w):
    dn = lax.conv_dimension_numbers(x.shape, w.shape, ("NHWC", "HWIO", "NHWC"))
    return lax.conv_general_dilated(x, w, (1, 1), "SAME", dimension_numbers=dn)


def _bn_ref(x, bn):
    gamma, beta, mean, var = bn
    return (x - mean) / jnp.sqrt(var + EPS) * gamma + beta


def residual_group_ref(x, block_params, final_w, final_b):
    h = x
    for p in block_params:
        dense = _bn_ref(_conv_ref(h, p["w3"]), p["bn3"])
        one = _bn_ref(_conv_ref(h, p["w1"]), p["bn1"])
        ident = _bn_ref(h, p["bni"])
        h = jnp.maximum(dense + one + ident, 0.0)
    return _conv_ref(h, final_w) + final_b + x


# ---------------------------------- main ----------------------------------- #
if __name__ == "__main__":
    N, C, H, W = 2, 8, 16, 16          # n_feat = 8  (W*C = 128, lane-dense)
    n_resblocks = 2

    key = jax.random.PRNGKey(0)
    kx, kf, kb, *kblocks = jax.random.split(key, 3 + n_resblocks)

    x = jax.random.normal(kx, (N, H, W, C), jnp.float32)        # NHWC
    block_params = [make_repvgg_block_params(k, C) for k in kblocks]
    final_w = 0.1 * jax.random.normal(kf, (3, 3, C, C), jnp.float32)
    final_b = 0.1 * jax.random.normal(kb, (C,), jnp.float32)

    # Stack all layers: n_resblocks fused RepVGG blocks + trailing conv.
    fused = [fuse_repvgg_block(p, C) for p in block_params]
    layer_w = jnp.stack([k for k, _ in fused] + [final_w])      # (L,3,3,C,C)
    layer_b = jnp.stack([b for _, b in fused] + [final_b])      # (L,C)

    out = residual_group_pallas(x, layer_w, layer_b)
    out = jax.block_until_ready(out)

    ref = residual_group_ref(x, block_params, final_w, final_b)
    assert out.shape == (N, H, W, C)
    # bf16 MXU matmuls (f32 accumulate) vs. f32 reference: relaxed tolerance.
    err = float(jnp.max(jnp.abs(out - ref)))
    assert jnp.allclose(out, ref, atol=1e-1, rtol=5e-2), err

    print("KERNEL_OK")
</pallas_src>

<mosaic_0001>
module attributes {stable_mosaic.version = 11 : i64} {
  func.func @_residual_group_kernel(%arg0: i32, %arg1: memref<1x16x128xf32, #tpu.memory_space<vmem>>, %arg2: memref<3x3x128x128xbf16, #tpu.memory_space<vmem>>, %arg3: memref<3x1x128xf32, #tpu.memory_space<vmem>>, %arg4: memref<1x16x128xf32, #tpu.memory_space<vmem>>, %arg5: memref<18x128xf32, #tpu.memory_space<vmem>>) attributes {dimension_semantics = [#tpu.dimension_semantics<parallel>], iteration_bounds = array<i64: 2>, scalar_prefetch = 0 : i64, scratch_operands = 1 : i64, tpu.core_type = #tpu.core_type<tc>, window_params = [{transform_indices = @transform_0, window_bounds = array<i64: 1, 16, 128>}, {pipeline_mode = #tpu.pipeline_mode<synchronous>, transform_indices = @transform_1, window_bounds = array<i64: 3, 3, 128, 128>}, {pipeline_mode = #tpu.pipeline_mode<synchronous>, transform_indices = @transform_2, window_bounds = array<i64: 3, 1, 128>}, {transform_indices = @transform_3, window_bounds = array<i64: 1, 16, 128>}]} {
    %cst = arith.constant 0.000000e+00 : f32
    %0 = vector.broadcast %cst : f32 to vector<1x128xf32>
    %c0 = arith.constant 0 : index
    %c0_0 = arith.constant 0 : index
    %1 = vector.load %arg5[%c0, %c0_0] : memref<18x128xf32, #tpu.memory_space<vmem>>, vector<1x128xf32>
    tpu.vector_store %arg5[%c0, %c0_0], %0 {strides = array<i32>} : memref<18x128xf32, #tpu.memory_space<vmem>>, vector<1x128xf32>,
    %cst_1 = arith.constant 0.000000e+00 : f32
    %2 = vector.broadcast %cst_1 : f32 to vector<1x128xf32>
    %c17 = arith.constant 17 : index
    %c0_2 = arith.constant 0 : index
    %3 = vector.load %arg5[%c17, %c0_2] : memref<18x128xf32, #tpu.memory_space<vmem>>, vector<1x128xf32>
    tpu.vector_store %arg5[%c17, %c0_2], %2 {strides = array<i32>} : memref<18x128xf32, #tpu.memory_space<vmem>>, vector<1x128xf32>,
    %c0_3 = arith.constant 0 : index
    %c0_4 = arith.constant 0 : index
    %c0_5 = arith.constant 0 : index
    %4 = vector.load %arg1[%c0_3, %c0_4, %c0_5] : memref<1x16x128xf32, #tpu.memory_space<vmem>>, vector<1x16x128xf32>
    %5 = vector.shape_cast %4 : vector<1x16x128xf32> to vector<16x128xf32>
    %c1 = arith.constant 1 : index
    %c0_6 = arith.constant 0 : index
    %6 = vector.load %arg5[%c1, %c0_6] : memref<18x128xf32, #tpu.memory_space<vmem>>, vector<16x128xf32>
    tpu.vector_store %arg5[%c1, %c0_6], %5 {strides = array<i32>} : memref<18x128xf32, #tpu.memory_space<vmem>>, vector<16x128xf32>,
    %c0_7 = arith.constant 0 : index
    %c0_8 = arith.constant 0 : index
    %c0_9 = arith.constant 0 : index
    %7 = vector.load %arg3[%c0_7, %c0_8, %c0_9] : memref<3x1x128xf32, #tpu.memory_space<vmem>>, vector<1x1x128xf32>
    %8 = vector.shape_cast %7 : vector<1x1x128xf32> to vector<1x128xf32>
    %c0_10 = arith.constant 0 : index
    %c0_11 = arith.constant 0 : index
    %9 = vector.load %arg5[%c0_10, %c0_11] : memref<18x128xf32, #tpu.memory_space<vmem>>, vector<16x128xf32>
    %10 = arith.truncf %9 : vector<16x128xf32> to vector<16x128xbf16>
    %c0_12 = arith.constant 0 : index
    %c0_13 = arith.constant 0 : index
    %c0_14 = arith.constant 0 : index
    %c0_15 = arith.constant 0 : index
    %11 = vector.load %arg2[%c0_12, %c0_13, %c0_14, %c0_15] : memref<3x3x128x128xbf16, #tpu.memory_space<vmem>>, vector<1x1x128x128xbf16>
    %12 = vector.shape_cast %11 : vector<1x1x128x128xbf16> to vector<128x128xbf16>
    %cst_16 = arith.constant dense<0.000000e+00> : vector<16x128xf32>
    %13 = tpu.matmul %10, %12, %cst_16 {dimension_numbers = #tpu.dot_dimension_numbers<[1], [0], [0], [1], [0, 0, 1, 1], [], []>} : vector<16x128xbf16>, vector<128x128xbf16>, vector<16x128xf32> -> vector<16x128xf32>
    %14 = vector.broadcast %8 : vector<1x128xf32> to vector<16x128xf32>
    %15 = arith.addf %14, %13 : vector<16x128xf32>
    %c1_17 = arith.constant 1 : index
    %c0_18 = arith.constant 0 : index
    %16 = vector.load %arg5[%c1_17, %c0_18] : memref<18x128xf32, #tpu.memory_space<vmem>>, vector<16x128xf32>
    %17 = arith.truncf %16 : vector<16x128xf32> to vector<16x128xbf16>
    %c0_19 = arith.constant 0 : index
    %c1_20 = arith.constant 1 : index
    %c0_21 = arith.constant 0 : index
    %c0_22 = arith.constant 0 : index
    %18 = vector.load %arg2[%c0_19, %c1_20, %c0_21, %c0_22] : memref<3x3x128x128xbf16, #tpu.memory_space<vmem>>, vector<1x1x128x128xbf16>
    %19 = vector.shape_cast %18 : vector<1x1x128x128xbf16> to vector<128x128xbf16>
    %cst_23 = arith.constant dense<0.000000e+00> : vector<16x128xf32>
    %20 = tpu.matmul %17, %19, %cst_23 {dimension_numbers = #tpu.dot_dimension_numbers<[1], [0], [0], [1], [0, 0, 1, 1], [], []>} : vector<16x128xbf16>, vector<128x128xbf16>, vector<16x128xf32> -> vector<16x128xf32>
    %21 = arith.addf %15, %20 : vector<16x128xf32>
    %c2 = arith.constant 2 : index
    %c0_24 = arith.constant 0 : index
    %22 = vector.load %arg5[%c2, %c0_24] : memref<18x128xf32, #tpu.memory_space<vmem>>, vector<16x128xf32>
    %23 = arith.truncf %22 : vector<16x128xf32> to vector<16x128xbf16>
    %c0_25 = arith.constant 0 : index
    %c2_26 = arith.constant 2 : index
    %c0_27 = arith.constant 0 : index
    %c0_28 = arith.constant 0 : index
    %24 = vector.load %arg2[%c0_25, %c2_26, %c0_27, %c0_28] : memref<3x3x128x128xbf16, #tpu.memory_space<vmem>>, vector<1x1x128x128xbf16>
    %25 = vector.shape_cast %24 : vector<1x1x128x128xbf16> to vector<128x128xbf16>
    %cst_29 = arith.constant dense<0.000000e+00> : vector<16x128xf32>
    %26 = tpu.matmul %23, %25, %cst_29 {dimension_numbers = #tpu.dot_dimension_numbers<[1], [0], [0], [1], [0, 0, 1, 1], [], []>} : vector<16x128xbf16>, vector<128x128xbf16>, vector<16x128xf32> -> vector<16x128xf32>
    %27 = arith.addf %21, %26 : vector<16x128xf32>
    %cst_30 = arith.constant 0.000000e+00 : f32
    %28 = vector.broadcast %cst_30 : f32 to vector<16x128xf32>
    %29 = arith.maximumf %27, %28 : vector<16x128xf32>
    %c1_31 = arith.constant 1 : index
    %c0_32 = arith.constant 0 : index
    %30 = vector.load %arg5[%c1_31, %c0_32] : memref<18x128xf32, #tpu.memory_space<vmem>>, vector<16x128xf32>
    tpu.vector_store %arg5[%c1_31, %c0_32], %29 {strides = array<i32>} : memref<18x128xf32, #tpu.memory_space<vmem>>, vector<16x128xf32>,
    %c1_33 = arith.constant 1 : index
    %c0_34 = arith.constant 0 : index
    %c0_35 = arith.constant 0 : index
    %31 = vector.load %arg3[%c1_33, %c0_34, %c0_35] : memref<3x1x128xf32, #tpu.memory_space<vmem>>, vector<1x1x128xf32>
    %32 = vector.shape_cast %31 : vector<1x1x128xf32> to vector<1x128xf32>
    %c0_36 = arith.constant 0 : index
    %c0_37 = arith.constant 0 : index
    %33 = vector.load %arg5[%c0_36, %c0_37] : memref<18x128xf32, #tpu.memory_space<vmem>>, vector<16x128xf32>
    %34 = arith.truncf %33 : vector<16x128xf32> to vector<16x128xbf16>
    %c1_38 = arith.constant 1 : index
    %c0_39 = arith.constant 0 : index
    %c0_40 = arith.constant 0 : index
    %c0_41 = arith.constant 0 : index
    %35 = vector.load %arg2[%c1_38, %c0_39, %c0_40, %c0_41] : memref<3x3x128x128xbf16, #tpu.memory_space<vmem>>, vector<1x1x128x128xbf16>
    %36 = vector.shape_cast %35 : vector<1x1x128x128xbf16> to vector<128x128xbf16>
    %cst_42 = arith.constant dense<0.000000e+00> : vector<16x128xf32>
    %37 = tpu.matmul %34, %36, %cst_42 {dimension_numbers = #tpu.dot_dimension_numbers<[1], [0], [0], [1], [0, 0, 1, 1], [], []>} : vector<16x128xbf16>, vector<128x128xbf16>, vector<16x128xf32> -> vector<16x128xf32>
    %38 = vector.broadcast %32 : vector<1x128xf32> to vector<16x128xf32>
    %39 = arith.addf %38, %37 : vector<16x128xf32>
    %c1_43 = arith.constant 1 : index
    %c0_44 = arith.constant 0 : index
    %40 = vector.load %arg5[%c1_43, %c0_44] : memref<18x128xf32, #tpu.memory_space<vmem>>, vector<16x128xf32>
    %41 = arith.truncf %40 : vector<16x128xf32> to vector<16x128xbf16>
    %c1_45 = arith.constant 1 : index
    %c1_46 = arith.constant 1 : index
    %c0_47 = arith.constant 0 : index
    %c0_48 = arith.constant 0 : index
    %42 = vector.load %arg2[%c1_45, %c1_46, %c0_47, %c0_48] : memref<3x3x128x128xbf16, #tpu.memory_space<vmem>>, vector<1x1x128x128xbf16>
    %43 = vector.shape_cast %42 : vector<1x1x128x128xbf16> to vector<128x128xbf16>
    %cst_49 = arith.constant dense<0.000000e+00> : vector<16x128xf32>
    %44 = tpu.matmul %41, %43, %cst_49 {dimension_numbers = #tpu.dot_dimension_numbers<[1], [0], [0], [1], [0, 0, 1, 1], [], []>} : vector<16x128xbf16>, vector<128x128xbf16>, vector<16x128xf32> -> vector<16x128xf32>
    %45 = arith.addf %39, %44 : vector<16x128xf32>
    %c2_50 = arith.constant 2 : index
    %c0_51 = arith.constant 0 : index
    %46 = vector.load %arg5[%c2_50, %c0_51] : memref<18x128xf32, #tpu.memory_space<vmem>>, vector<16x128xf32>
    %47 = arith.truncf %46 : vector<16x128xf32> to vector<16x128xbf16>
    %c1_52 = arith.constant 1 : index
    %c2_53 = arith.constant 2 : index
    %c0_54 = arith.constant 0 : index
    %c0_55 = arith.constant 0 : index
    %48 = vector.load %arg2[%c1_52, %c2_53, %c0_54, %c0_55] : memref<3x3x128x128xbf16, #tpu.memory_space<vmem>>, vector<1x1x128x128xbf16>
    %49 = vector.shape_cast %48 : vector<1x1x128x128xbf16> to vector<128x128xbf16>
    %cst_56 = arith.constant dense<0.000000e+00> : vector<16x128xf32>
    %50 = tpu.matmul %47, %49, %cst_56 {dimension_numbers = #tpu.dot_dimension_numbers<[1], [0], [0], [1], [0, 0, 1, 1], [], []>} : vector<16x128xbf16>, vector<128x128xbf16>, vector<16x128xf32> -> vector<16x128xf32>
    %51 = arith.addf %45, %50 : vector<16x128xf32>
    %cst_57 = arith.constant 0.000000e+00 : f32
    %52 = vector.broadcast %cst_57 : f32 to vector<16x128xf32>
    %53 = arith.maximumf %51, %52 : vector<16x128xf32>
    %c1_58 = arith.constant 1 : index
    %c0_59 = arith.constant 0 : index
    %54 = vector.load %arg5[%c1_58, %c0_59] : memref<18x128xf32, #tpu.memory_space<vmem>>, vector<16x128xf32>
    tpu.vector_store %arg5[%c1_58, %c0_59], %53 {strides = array<i32>} : memref<18x128xf32, #tpu.memory_space<vmem>>, vector<16x128xf32>,
    %c2_60 = arith.constant 2 : index
    %c0_61 = arith.constant 0 : index
    %c0_62 = arith.constant 0 : index
    %55 = vector.load %arg3[%c2_60, %c0_61, %c0_62] : memref<3x1x128xf32, #tpu.memory_space<vmem>>, vector<1x1x128xf32>
    %56 = vector.shape_cast %55 : vector<1x1x128xf32> to vector<1x128xf32>
    %c0_63 = arith.constant 0 : index
    %c0_64 = arith.constant 0 : index
    %57 = vector.load %arg5[%c0_63, %c0_64] : memref<18x128xf32, #tpu.memory_space<vmem>>, vector<16x128xf32>
    %58 = arith.truncf %57 : vector<16x128xf32> to vector<16x128xbf16>
    %c2_65 = arith.constant 2 : index
    %c0_66 = arith.constant 0 : index
    %c0_67 = arith.constant 0 : index
    %c0_68 = arith.constant 0 : index
    %59 = vector.load %arg2[%c2_65, %c0_66, %c0_67, %c0_68] : memref<3x3x128x128xbf16, #tpu.memory_space<vmem>>, vector<1x1x128x128xbf16>
    %60 = vector.shape_cast %59 : vector<1x1x128x128xbf16> to vector<128x128xbf16>
    %cst_69 = arith.constant dense<0.000000e+00> : vector<16x128xf32>
    %61 = tpu.matmul %58, %60, %cst_69 {dimension_numbers = #tpu.dot_dimension_numbers<[1], [0], [0], [1], [0, 0, 1, 1], [], []>} : vector<16x128xbf16>, vector<128x128xbf16>, vector<16x128xf32> -> vector<16x128xf32>
    %62 = vector.broadcast %56 : vector<1x128xf32> to vector<16x128xf32>
    %63 = arith.addf %62, %61 : vector<16x128xf32>
    %c1_70 = arith.constant 1 : index
    %c0_71 = arith.constant 0 : index
    %64 = vector.load %arg5[%c1_70, %c0_71] : memref<18x128xf32, #tpu.memory_space<vmem>>, vector<16x128xf32>
    %65 = arith.truncf %64 : vector<16x128xf32> to vector<16x128xbf16>
    %c2_72 = arith.constant 2 : index
    %c1_73 = arith.constant 1 : index
    %c0_74 = arith.constant 0 : index
    %c0_75 = arith.constant 0 : index
    %66 = vector.load %arg2[%c2_72, %c1_73, %c0_74, %c0_75] : memref<3x3x128x128xbf16, #tpu.memory_space<vmem>>, vector<1x1x128x128xbf16>
    %67 = vector.shape_cast %66 : vector<1x1x128x128xbf16> to vector<128x128xbf16>
    %cst_76 = arith.constant dense<0.000000e+00> : vector<16x128xf32>
    %68 = tpu.matmul %65, %67, %cst_76 {dimension_numbers = #tpu.dot_dimension_numbers<[1], [0], [0], [1], [0, 0, 1, 1], [], []>} : vector<16x128xbf16>, vector<128x128xbf16>, vector<16x128xf32> -> vector<16x128xf32>
    %69 = arith.addf %63, %68 : vector<16x128xf32>
    %c2_77 = arith.constant 2 : index
    %c0_78 = arith.constant 0 : index
    %70 = vector.load %arg5[%c2_77, %c0_78] : memref<18x128xf32, #tpu.memory_space<vmem>>, vector<16x128xf32>
    %71 = arith.truncf %70 : vector<16x128xf32> to vector<16x128xbf16>
    %c2_79 = arith.constant 2 : index
    %c2_80 = arith.constant 2 : index
    %c0_81 = arith.constant 0 : index
    %c0_82 = arith.constant 0 : index
    %72 = vector.load %arg2[%c2_79, %c2_80, %c0_81, %c0_82] : memref<3x3x128x128xbf16, #tpu.memory_space<vmem>>, vector<1x1x128x128xbf16>
    %73 = vector.shape_cast %72 : vector<1x1x128x128xbf16> to vector<128x128xbf16>
    %cst_83 = arith.constant dense<0.000000e+00> : vector<16x128xf32>
    %74 = tpu.matmul %71, %73, %cst_83 {dimension_numbers = #tpu.dot_dimension_numbers<[1], [0], [0], [1], [0, 0, 1, 1], [], []>} : vector<16x128xbf16>, vector<128x128xbf16>, vector<16x128xf32> -> vector<16x128xf32>
    %75 = arith.addf %69, %74 : vector<16x128xf32>
    %76 = arith.addf %75, %5 : vector<16x128xf32>
    %c0_84 = arith.constant 0 : index
    %c0_85 = arith.constant 0 : index
    %c0_86 = arith.constant 0 : index
    %77 = vector.load %arg4[%c0_84, %c0_85, %c0_86] : memref<1x16x128xf32, #tpu.memory_space<vmem>>, vector<1x16x128xf32>
    %78 = vector.shape_cast %77 : vector<1x16x128xf32> to vector<16x128xf32>
    %79 = vector.shape_cast %76 : vector<16x128xf32> to vector<1x16x128xf32>
    tpu.vector_store %arg4[%c0_84, %c0_85, %c0_86], %79 {strides = array<i32>} : memref<1x16x128xf32, #tpu.memory_space<vmem>>, vector<1x16x128xf32>,
    return
  }
  func.func @transform_0(%arg0: i32) -> (i32, i32, i32) {
    %c0_i32 = arith.constant 0 : i32
    %c0_i32_0 = arith.constant 0 : i32
    %c0_i32_1 = arith.constant 0 : i32
    return %arg0, %c0_i32, %c0_i32_0 : i32, i32, i32
  }
  func.func @transform_1(%arg0: i32) -> (i32, i32, i32, i32) {
    %c0_i32 = arith.constant 0 : i32
    %c0_i32_0 = arith.constant 0 : i32
    %c0_i32_1 = arith.constant 0 : i32
    %c0_i32_2 = arith.constant 0 : i32
    %c0_i32_3 = arith.constant 0 : i32
    return %c0_i32, %c0_i32_0, %c0_i32_1, %c0_i32_2 : i32, i32, i32, i32
  }
  func.func @transform_2(%arg0: i32) -> (i32, i32, i32) {
    %c0_i32 = arith.constant 0 : i32
    %c0_i32_0 = arith.constant 0 : i32
    %c0_i32_1 = arith.constant 0 : i32
    %c0_i32_2 = arith.constant 0 : i32
    return %c0_i32, %c0_i32_0, %c0_i32_1 : i32, i32, i32
  }
  func.func @transform_3(%arg0: i32) -> (i32, i32, i32) {
    %c0_i32 = arith.constant 0 : i32
    %c0_i32_0 = arith.constant 0 : i32
    %c0_i32_1 = arith.constant 0 : i32
    return %arg0, %c0_i32, %c0_i32_0 : i32, i32, i32
  }
}

module attributes {stable_mosaic.version = 11 : i64} {
  func.func @_residual_group_kernel(%arg0: i32, %arg1: memref<1x16x128xf32, #tpu.memory_space<vmem>>, %arg2: memref<3x3x128x128xbf16, #tpu.memory_space<vmem>>, %arg3: memref<3x1x128xf32, #tpu.memory_space<vmem>>, %arg4: memref<1x16x128xf32, #tpu.memory_space<vmem>>, %arg5: memref<18x128xf32, #tpu.memory_space<vmem>>) attributes {dimension_semantics = [#tpu.dimension_semantics<parallel>], iteration_bounds = array<i64: 2>, scalar_prefetch = 0 : i64, scratch_operands = 1 : i64, tpu.core_type = #tpu.core_type<tc>, window_params = [{transform_indices = @transform_0, window_bounds = array<i64: 1, 16, 128>}, {pipeline_mode = #tpu.pipeline_mode<synchronous>, transform_indices = @transform_1, window_bounds = array<i64: 3, 3, 128, 128>}, {pipeline_mode = #tpu.pipeline_mode<synchronous>, transform_indices = @transform_2, window_bounds = array<i64: 3, 1, 128>}, {transform_indices = @transform_3, window_bounds = array<i64: 1, 16, 128>}]} {
    %cst = arith.constant 0.000000e+00 : f32
    %0 = vector.broadcast %cst : f32 to vector<1x128xf32>
    %c0 = arith.constant 0 : index
    %c0_0 = arith.constant 0 : index
    %1 = vector.load %arg5[%c0, %c0_0] : memref<18x128xf32, #tpu.memory_space<vmem>>, vector<1x128xf32>
    tpu.vector_store %arg5[%c0, %c0_0], %0 {strides = array<i32>} : memref<18x128xf32, #tpu.memory_space<vmem>>, vector<1x128xf32>,
    %cst_1 = arith.constant 0.000000e+00 : f32
    %2 = vector.broadcast %cst_1 : f32 to vector<1x128xf32>
    %c17 = arith.constant 17 : index
    %c0_2 = arith.constant 0 : index
    %3 = vector.load %arg5[%c17, %c0_2] : memref<18x128xf32, #tpu.memory_space<vmem>>, vector<1x128xf32>
    tpu.vector_store %arg5[%c17, %c0_2], %2 {strides = array<i32>} : memref<18x128xf32, #tpu.memory_space<vmem>>, vector<1x128xf32>,
    %c0_3 = arith.constant 0 : index
    %c0_4 = arith.constant 0 : index
    %c0_5 = arith.constant 0 : index
    %4 = vector.load %arg1[%c0_3, %c0_4, %c0_5] : memref<1x16x128xf32, #tpu.memory_space<vmem>>, vector<1x16x128xf32>
    %5 = vector.shape_cast %4 : vector<1x16x128xf32> to vector<16x128xf32>
    %c1 = arith.constant 1 : index
    %c0_6 = arith.constant 0 : index
    %6 = vector.load %arg5[%c1, %c0_6] : memref<18x128xf32, #tpu.memory_space<vmem>>, vector<16x128xf32>
    tpu.vector_store %arg5[%c1, %c0_6], %5 {strides = array<i32>} : memref<18x128xf32, #tpu.memory_space<vmem>>, vector<16x128xf32>,
    %c0_7 = arith.constant 0 : index
    %c0_8 = arith.constant 0 : index
    %c0_9 = arith.constant 0 : index
    %7 = vector.load %arg3[%c0_7, %c0_8, %c0_9] : memref<3x1x128xf32, #tpu.memory_space<vmem>>, vector<1x1x128xf32>
    %8 = vector.shape_cast %7 : vector<1x1x128xf32> to vector<1x128xf32>
    %c0_10 = arith.constant 0 : index
    %c0_11 = arith.constant 0 : index
    %9 = vector.load %arg5[%c0_10, %c0_11] : memref<18x128xf32, #tpu.memory_space<vmem>>, vector<16x128xf32>
    %10 = arith.truncf %9 : vector<16x128xf32> to vector<16x128xbf16>
    %c0_12 = arith.constant 0 : index
    %c0_13 = arith.constant 0 : index
    %c0_14 = arith.constant 0 : index
    %c0_15 = arith.constant 0 : index
    %11 = vector.load %arg2[%c0_12, %c0_13, %c0_14, %c0_15] : memref<3x3x128x128xbf16, #tpu.memory_space<vmem>>, vector<1x1x128x128xbf16>
    %12 = vector.shape_cast %11 : vector<1x1x128x128xbf16> to vector<128x128xbf16>
    %cst_16 = arith.constant dense<0.000000e+00> : vector<16x128xf32>
    %13 = tpu.matmul %10, %12, %cst_16 {dimension_numbers = #tpu.dot_dimension_numbers<[1], [0], [0], [1], [0, 0, 1, 1], [], []>} : vector<16x128xbf16>, vector<128x128xbf16>, vector<16x128xf32> -> vector<16x128xf32>
    %14 = vector.broadcast %8 : vector<1x128xf32> to vector<16x128xf32>
    %15 = arith.addf %14, %13 : vector<16x128xf32>
    %c1_17 = arith.constant 1 : index
    %c0_18 = arith.constant 0 : index
    %16 = vector.load %arg5[%c1_17, %c0_18] : memref<18x128xf32, #tpu.memory_space<vmem>>, vector<16x128xf32>
    %17 = arith.truncf %16 : vector<16x128xf32> to vector<16x128xbf16>
    %c0_19 = arith.constant 0 : index
    %c1_20 = arith.constant 1 : index
    %c0_21 = arith.constant 0 : index
    %c0_22 = arith.constant 0 : index
    %18 = vector.load %arg2[%c0_19, %c1_20, %c0_21, %c0_22] : memref<3x3x128x128xbf16, #tpu.memory_space<vmem>>, vector<1x1x128x128xbf16>
    %19 = vector.shape_cast %18 : vector<1x1x128x128xbf16> to vector<128x128xbf16>
    %cst_23 = arith.constant dense<0.000000e+00> : vector<16x128xf32>
    %20 = tpu.matmul %17, %19, %cst_23 {dimension_numbers = #tpu.dot_dimension_numbers<[1], [0], [0], [1], [0, 0, 1, 1], [], []>} : vector<16x128xbf16>, vector<128x128xbf16>, vector<16x128xf32> -> vector<16x128xf32>
    %21 = arith.addf %15, %20 : vector<16x128xf32>
    %c2 = arith.constant 2 : index
    %c0_24 = arith.constant 0 : index
    %22 = vector.load %arg5[%c2, %c0_24] : memref<18x128xf32, #tpu.memory_space<vmem>>, vector<16x128xf32>
    %23 = arith.truncf %22 : vector<16x128xf32> to vector<16x128xbf16>
    %c0_25 = arith.constant 0 : index
    %c2_26 = arith.constant 2 : index
    %c0_27 = arith.constant 0 : index
    %c0_28 = arith.constant 0 : index
    %24 = vector.load %arg2[%c0_25, %c2_26, %c0_27, %c0_28] : memref<3x3x128x128xbf16, #tpu.memory_space<vmem>>, vector<1x1x128x128xbf16>
    %25 = vector.shape_cast %24 : vector<1x1x128x128xbf16> to vector<128x128xbf16>
    %cst_29 = arith.constant dense<0.000000e+00> : vector<16x128xf32>
    %26 = tpu.matmul %23, %25, %cst_29 {dimension_numbers = #tpu.dot_dimension_numbers<[1], [0], [0], [1], [0, 0, 1, 1], [], []>} : vector<16x128xbf16>, vector<128x128xbf16>, vector<16x128xf32> -> vector<16x128xf32>
    %27 = arith.addf %21, %26 : vector<16x128xf32>
    %cst_30 = arith.constant 0.000000e+00 : f32
    %28 = vector.broadcast %cst_30 : f32 to vector<16x128xf32>
    %29 = arith.maximumf %27, %28 : vector<16x128xf32>
    %c1_31 = arith.constant 1 : index
    %c0_32 = arith.constant 0 : index
    %30 = vector.load %arg5[%c1_31, %c0_32] : memref<18x128xf32, #tpu.memory_space<vmem>>, vector<16x128xf32>
    tpu.vector_store %arg5[%c1_31, %c0_32], %29 {strides = array<i32>} : memref<18x128xf32, #tpu.memory_space<vmem>>, vector<16x128xf32>,
    %c1_33 = arith.constant 1 : index
    %c0_34 = arith.constant 0 : index
    %c0_35 = arith.constant 0 : index
    %31 = vector.load %arg3[%c1_33, %c0_34, %c0_35] : memref<3x1x128xf32, #tpu.memory_space<vmem>>, vector<1x1x128xf32>
    %32 = vector.shape_cast %31 : vector<1x1x128xf32> to vector<1x128xf32>
    %c0_36 = arith.constant 0 : index
    %c0_37 = arith.constant 0 : index
    %33 = vector.load %arg5[%c0_36, %c0_37] : memref<18x128xf32, #tpu.memory_space<vmem>>, vector<16x128xf32>
    %34 = arith.truncf %33 : vector<16x128xf32> to vector<16x128xbf16>
    %c1_38 = arith.constant 1 : index
    %c0_39 = arith.constant 0 : index
    %c0_40 = arith.constant 0 : index
    %c0_41 = arith.constant 0 : index
    %35 = vector.load %arg2[%c1_38, %c0_39, %c0_40, %c0_41] : memref<3x3x128x128xbf16, #tpu.memory_space<vmem>>, vector<1x1x128x128xbf16>
    %36 = vector.shape_cast %35 : vector<1x1x128x128xbf16> to vector<128x128xbf16>
    %cst_42 = arith.constant dense<0.000000e+00> : vector<16x128xf32>
    %37 = tpu.matmul %34, %36, %cst_42 {dimension_numbers = #tpu.dot_dimension_numbers<[1], [0], [0], [1], [0, 0, 1, 1], [], []>} : vector<16x128xbf16>, vector<128x128xbf16>, vector<16x128xf32> -> vector<16x128xf32>
    %38 = vector.broadcast %32 : vector<1x128xf32> to vector<16x128xf32>
    %39 = arith.addf %38, %37 : vector<16x128xf32>
    %c1_43 = arith.constant 1 : index
    %c0_44 = arith.constant 0 : index
    %40 = vector.load %arg5[%c1_43, %c0_44] : memref<18x128xf32, #tpu.memory_space<vmem>>, vector<16x128xf32>
    %41 = arith.truncf %40 : vector<16x128xf32> to vector<16x128xbf16>
    %c1_45 = arith.constant 1 : index
    %c1_46 = arith.constant 1 : index
    %c0_47 = arith.constant 0 : index
    %c0_48 = arith.constant 0 : index
    %42 = vector.load %arg2[%c1_45, %c1_46, %c0_47, %c0_48] : memref<3x3x128x128xbf16, #tpu.memory_space<vmem>>, vector<1x1x128x128xbf16>
    %43 = vector.shape_cast %42 : vector<1x1x128x128xbf16> to vector<128x128xbf16>
    %cst_49 = arith.constant dense<0.000000e+00> : vector<16x128xf32>
    %44 = tpu.matmul %41, %43, %cst_49 {dimension_numbers = #tpu.dot_dimension_numbers<[1], [0], [0], [1], [0, 0, 1, 1], [], []>} : vector<16x128xbf16>, vector<128x128xbf16>, vector<16x128xf32> -> vector<16x128xf32>
    %45 = arith.addf %39, %44 : vector<16x128xf32>
    %c2_50 = arith.constant 2 : index
    %c0_51 = arith.constant 0 : index
    %46 = vector.load %arg5[%c2_50, %c0_51] : memref<18x128xf32, #tpu.memory_space<vmem>>, vector<16x128xf32>
    %47 = arith.truncf %46 : vector<16x128xf32> to vector<16x128xbf16>
    %c1_52 = arith.constant 1 : index
    %c2_53 = arith.constant 2 : index
    %c0_54 = arith.constant 0 : index
    %c0_55 = arith.constant 0 : index
    %48 = vector.load %arg2[%c1_52, %c2_53, %c0_54, %c0_55] : memref<3x3x128x128xbf16, #tpu.memory_space<vmem>>, vector<1x1x128x128xbf16>
    %49 = vector.shape_cast %48 : vector<1x1x128x128xbf16> to vector<128x128xbf16>
    %cst_56 = arith.constant dense<0.000000e+00> : vector<16x128xf32>
    %50 = tpu.matmul %47, %49, %cst_56 {dimension_numbers = #tpu.dot_dimension_numbers<[1], [0], [0], [1], [0, 0, 1, 1], [], []>} : vector<16x128xbf16>, vector<128x128xbf16>, vector<16x128xf32> -> vector<16x128xf32>
    %51 = arith.addf %45, %50 : vector<16x128xf32>
    %cst_57 = arith.constant 0.000000e+00 : f32
    %52 = vector.broadcast %cst_57 : f32 to vector<16x128xf32>
    %53 = arith.maximumf %51, %52 : vector<16x128xf32>
    %c1_58 = arith.constant 1 : index
    %c0_59 = arith.constant 0 : index
    %54 = vector.load %arg5[%c1_58, %c0_59] : memref<18x128xf32, #tpu.memory_space<vmem>>, vector<16x128xf32>
    tpu.vector_store %arg5[%c1_58, %c0_59], %53 {strides = array<i32>} : memref<18x128xf32, #tpu.memory_space<vmem>>, vector<16x128xf32>,
    %c2_60 = arith.constant 2 : index
    %c0_61 = arith.constant 0 : index
    %c0_62 = arith.constant 0 : index
    %55 = vector.load %arg3[%c2_60, %c0_61, %c0_62] : memref<3x1x128xf32, #tpu.memory_space<vmem>>, vector<1x1x128xf32>
    %56 = vector.shape_cast %55 : vector<1x1x128xf32> to vector<1x128xf32>
    %c0_63 = arith.constant 0 : index
    %c0_64 = arith.constant 0 : index
    %57 = vector.load %arg5[%c0_63, %c0_64] : memref<18x128xf32, #tpu.memory_space<vmem>>, vector<16x128xf32>
    %58 = arith.truncf %57 : vector<16x128xf32> to vector<16x128xbf16>
    %c2_65 = arith.constant 2 : index
    %c0_66 = arith.constant 0 : index
    %c0_67 = arith.constant 0 : index
    %c0_68 = arith.constant 0 : index
    %59 = vector.load %arg2[%c2_65, %c0_66, %c0_67, %c0_68] : memref<3x3x128x128xbf16, #tpu.memory_space<vmem>>, vector<1x1x128x128xbf16>
    %60 = vector.shape_cast %59 : vector<1x1x128x128xbf16> to vector<128x128xbf16>
    %cst_69 = arith.constant dense<0.000000e+00> : vector<16x128xf32>
    %61 = tpu.matmul %58, %60, %cst_69 {dimension_numbers = #tpu.dot_dimension_numbers<[1], [0], [0], [1], [0, 0, 1, 1], [], []>} : vector<16x128xbf16>, vector<128x128xbf16>, vector<16x128xf32> -> vector<16x128xf32>
    %62 = vector.broadcast %56 : vector<1x128xf32> to vector<16x128xf32>
    %63 = arith.addf %62, %61 : vector<16x128xf32>
    %c1_70 = arith.constant 1 : index
    %c0_71 = arith.constant 0 : index
    %64 = vector.load %arg5[%c1_70, %c0_71] : memref<18x128xf32, #tpu.memory_space<vmem>>, vector<16x128xf32>
    %65 = arith.truncf %64 : vector<16x128xf32> to vector<16x128xbf16>
    %c2_72 = arith.constant 2 : index
    %c1_73 = arith.constant 1 : index
    %c0_74 = arith.constant 0 : index
    %c0_75 = arith.constant 0 : index
    %66 = vector.load %arg2[%c2_72, %c1_73, %c0_74, %c0_75] : memref<3x3x128x128xbf16, #tpu.memory_space<vmem>>, vector<1x1x128x128xbf16>
    %67 = vector.shape_cast %66 : vector<1x1x128x128xbf16> to vector<128x128xbf16>
    %cst_76 = arith.constant dense<0.000000e+00> : vector<16x128xf32>
    %68 = tpu.matmul %65, %67, %cst_76 {dimension_numbers = #tpu.dot_dimension_numbers<[1], [0], [0], [1], [0, 0, 1, 1], [], []>} : vector<16x128xbf16>, vector<128x128xbf16>, vector<16x128xf32> -> vector<16x128xf32>
    %69 = arith.addf %63, %68 : vector<16x128xf32>
    %c2_77 = arith.constant 2 : index
    %c0_78 = arith.constant 0 : index
    %70 = vector.load %arg5[%c2_77, %c0_78] : memref<18x128xf32, #tpu.memory_space<vmem>>, vector<16x128xf32>
    %71 = arith.truncf %70 : vector<16x128xf32> to vector<16x128xbf16>
    %c2_79 = arith.constant 2 : index
    %c2_80 = arith.constant 2 : index
    %c0_81 = arith.constant 0 : index
    %c0_82 = arith.constant 0 : index
    %72 = vector.load %arg2[%c2_79, %c2_80, %c0_81, %c0_82] : memref<3x3x128x128xbf16, #tpu.memory_space<vmem>>, vector<1x1x128x128xbf16>
    %73 = vector.shape_cast %72 : vector<1x1x128x128xbf16> to vector<128x128xbf16>
    %cst_83 = arith.constant dense<0.000000e+00> : vector<16x128xf32>
    %74 = tpu.matmul %71, %73, %cst_83 {dimension_numbers = #tpu.dot_dimension_numbers<[1], [0], [0], [1], [0, 0, 1, 1], [], []>} : vector<16x128xbf16>, vector<128x128xbf16>, vector<16x128xf32> -> vector<16x128xf32>
    %75 = arith.addf %69, %74 : vector<16x128xf32>
    %76 = arith.addf %75, %5 : vector<16x128xf32>
    %c0_84 = arith.constant 0 : index
    %c0_85 = arith.constant 0 : index
    %c0_86 = arith.constant 0 : index
    %77 = vector.load %arg4[%c0_84, %c0_85, %c0_86] : memref<1x16x128xf32, #tpu.memory_space<vmem>>, vector<1x16x128xf32>
    %78 = vector.shape_cast %77 : vector<1x16x128xf32> to vector<16x128xf32>
    %79 = vector.shape_cast %76 : vector<16x128xf32> to vector<1x16x128xf32>
    tpu.vector_store %arg4[%c0_84, %c0_85, %c0_86], %79 {strides = array<i32>} : memref<1x16x128xf32, #tpu.memory_space<vmem>>, vector<1x16x128xf32>,
    return
  }
  func.func @transform_0(%arg0: i32) -> (i32, i32, i32) {
    %c0_i32 = arith.constant 0 : i32
    %c0_i32_0 = arith.constant 0 : i32
    %c0_i32_1 = arith.constant 0 : i32
    return %arg0, %c0_i32, %c0_i32_0 : i32, i32, i32
  }
  func.func @transform_1(%arg0: i32) -> (i32, i32, i32, i32) {
    %c0_i32 = arith.constant 0 : i32
    %c0_i32_0 = arith.constant 0 : i32
    %c0_i32_1 = arith.constant 0 : i32
    %c0_i32_2 = arith.constant 0 : i32
    %c0_i32_3 = arith.constant 0 : i32
    return %c0_i32, %c0_i32_0, %c0_i32_1, %c0_i32_2 : i32, i32, i32, i32
  }
  func.func @transform_2(%arg0: i32) -> (i32, i32, i32) {
    %c0_i32 = arith.constant 0 : i32
    %c0_i32_0 = arith.constant 0 : i32
    %c0_i32_1 = arith.constant 0 : i32
    %c0_i32_2 = arith.constant 0 : i32
    return %c0_i32, %c0_i32_0, %c0_i32_1 : i32, i32, i32
  }
  func.func @transform_3(%arg0: i32) -> (i32, i32, i32) {
    %c0_i32 = arith.constant 0 : i32
    %c0_i32_0 = arith.constant 0 : i32
    %c0_i32_1 = arith.constant 0 : i32
    return %arg0, %c0_i32, %c0_i32_0 : i32, i32, i32
  }
}

</mosaic_0001>

<bundles_post_ra>
// kernel: tpu_custom_call.1
= control target key start
LH: loop header
LB: loop body
LE: loop exit
PB: predicated region body
PF: predicated region fallthrough
CT: control target
= control target key end

     0   :  { %8 = vsyncpa [#allocation4], 0  ;;  %s2331_s0 = inlined_call_operand.hbm [shape: f32[2,16,128], index: 0, kind: input, shape index: {}]   ;;  %s2332_s1 = inlined_call_operand.hbm [shape: bf16[3,3,128,128], index: 1, kind: input, shape index: {}]   ;;  %s2333_s2 = inlined_call_operand.vmem [shape: f32[3,1,128], index: 2, kind: input, shape index: {}]   ;;  %s2334_s3 = inlined_call_operand.hbm [shape: f32[2,16,128], index: 3, kind: output, shape index: {}]  }
   0x1   :  { %10 = vsyncpa [#allocation4 + $0x1], 0 }
   0x2   :  { %11 = vsyncpa [#allocation7], 0 }
   0x3   :  { %12 = vsyncpa [#allocation5], 0 }
   0x4   :  { %14 = vsyncpa [#allocation5 + $0x1], 0  ;;  %s2015_s12 = smov 0   ;;  %s2017_s13 = smov 0  }
   0x5   :  { %s2019_s14 = smov 0   ;;  %s2021_s15 = smov 0  }
   0x6 LB: > { %s2036_s16 = sadd.s32 4294967295, %s1982_s15   ;;  %s1341_s17 = sadd.s32 4294967294, %s1982_s15   ;;  %s1982_s15 = sphi %s2021_s15, %s2354_s15   ;;  %s1978_s14 = sphi %s2019_s14, %s2353_s14   ;;  %s1974_s13 = sphi %s2017_s13, %s2352_s13   ;;  %s1970_s12 = sphi %s2015_s12, %s2351_s12  }
   0x7   : > { %p40_p0 = scmp.ne.s32.totalorder %s1974_s13, %s1970_s12  ;;  %p2335_p1 = scmp.eq.s32.totalorder %s2036_s16, 0 }
   0x8   : > { %p112_p3 = scmp.eq.s32.totalorder %s1341_s17, 1  ;;  %p1342_p5 = scmp.ge.s32.totalorder %s1982_s15, 1 }
   0x9   : > { %p2045_p4 = por %p2335_p1, %p40_p0  ;;  %p119_p7 = scmp.lt.s32.totalorder %s1982_s15, 3 }
   0xa   : > { %p2050_p6 = por %p112_p3, %p40_p0  ;;  %s1984_s21 = smov [#allocation6]  }
   0xb   : > { %s2338_s18 = scalar_select %p2045_p4, 1, 0 }
   0xc   : > { %s2339_s19 = scalar_select %p2050_p6, 1, 0 }
   0xd   : > { %p2055_p8 = pnand %p1342_p5, %p119_p7  ;;  %s131_s22 = sshll.u32 %s1984_s21, 4  ;;  %s2059_s22 = int_to_ptr.vmem [resolvable:$true] %s131_s22 }
   0xe   : > { %s2071_s24 = sadd.s32 1, %s1982_s15   ;;  %s27_s25 = sadd.s32 1, %s1978_s14 }
   0xf   : > { %s2340_s20 = scalar_select %p2055_p8, 1, 0 }
  0x10   : > { %p1725_p9 = pneg %p2055_p8  ;;  %s24_s26 = ssub.s32 %s1982_s15, %s2071_s24 }
  0x11   : > { %s1854_s29 = scalar_lea.hbm %s2332_s1, 9216 }
  0x12   : > { %p2066_p11 = pnand %p1725_p9, %p2335_p1  ;;  %p1855_p12 = scmp.ne.s32.totalorder %s2332_s1, %s1854_s29 }
  0x13   : > { %p1861_p5 = scmp.lt.u32.totalorder %s1854_s29, %s2332_s1 }
  0x14   : > { %p1856_p13 = pneg %p2066_p11 }
  0x16   : > { %p1857_p0 = pnand %p1856_p13, %p1855_p12 }
  0x18   : > { %p1858_p3 = pneg %p1857_p0 }
  0x1a   : > { %p1863_p7 = pnand %p1861_p5, %p1858_p3 }
  0x1c   : > { %1866 = shalt.err (!%p1863_p7)
}
  0x1d   : > { %s1867_s7 = scalar_lea.vmem %s2059_s22, 9216  ;;  %p1875_p2 = scmp.lt.s32.totalorder %s2059_s22, %s2059_s22 }
  0x1e   : > { %p1868_p9 = scmp.ne.s32.totalorder %s2059_s22, %s1867_s7  ;;  %p1876_p6 = scmp.lt.s32.totalorder %s1867_s7, %s1867_s7 }
  0x20   : > { %p1870_p10 = pnand %p1868_p9, %p1856_p13  ;;  %p1877_p4 = por %p1876_p6, %p1875_p2 }
  0x22   : > { %p1871_p1 = pneg %p1870_p10 }
  0x24   : > { %p1878_p8 = pnand %p1877_p4, %p1871_p1 }
  0x26   : > { %1881 = shalt.err (!%p1878_p8)
}
  0x27   : > { %s1985_s8 = smov 64   ;;  %s1986_s9 = smov 4  }
  0x28   : > { %1728 = dma.hbm_to_vmem [thread:$0]  (!%p2066_p11), %s2332_s1, 9216, %s2059_s22, [#allocation7], %s1985_s8, %s1985_s8, %s1986_s9  }
  0x29   : > { %p25_p2 = scmp.eq.s32.totalorder %s24_s26, 0  ;;  %p34_p1 = scmp.ne.s32.totalorder %s1978_s14, %s1974_s13 }
  0x2a   : > { %p35_p4 = scmp.eq.s32.totalorder %s1982_s15, 0  ;;  %p1738_p6 = scmp.lt.s32.totalorder %s1982_s15, 2 }
  0x2b   : > { %s2102_s17 = scalar_select %p25_p2, %s1978_s14, %s27_s25  }
  0x2c   : > { %p36_p8 = por %p35_p4, %p34_p1  ;;  %p2342_p10 = scmp.eq.s32.totalorder %s2036_s16, 1 }
  0x2d   : > { %s148_s27 = sand.u32 1, %s1978_s14   ;;  %s1434_s28 = sshll.u32 %s1982_s15, 8 }
  0x2e   : > { %p2106_p12 = por %p2342_p10, %p34_p1  ;;  %s1345_s29 = sshll.u32 %s148_s27, 4 }
  0x2f   : > { %s2115_s4 = scalar_lea.hbm %s2331_s0, %s1434_s28  ;;  %s152_s22 = scalar_lea.vmem [#allocation3], %s1345_s29 }
  0x30   : > { %s159_s25 = sshll.u32 %s152_s22, 4  ;;  %p2117_p11 = pnand %p1738_p6, %p36_p8  ;;  %s2121_s25 = int_to_ptr.vmem [resolvable:$true] %s159_s25 }
  0x31   : > { %s2123_s5 = scalar_lea.sflag [#allocation4], %s148_s27  ;;  %s1882_s6 = scalar_lea.hbm %s2115_s4, 256 }
  0x32   : > { %p1883_p13 = scmp.ne.s32.totalorder %s2115_s4, %s1882_s6  ;;  %p1884_p0 = pneg %p2117_p11 }
  0x33   : > { %s1887_s9 = scalar_lea.hbm %s2331_s0, 512  ;;  %p1888_p7 = scmp.lt.u32.totalorder %s2115_s4, %s2331_s0 }
  0x34   : > { %p1885_p3 = pnand %p1884_p0, %p1883_p13  ;;  %p1889_p9 = scmp.lt.u32.totalorder %s1887_s9, %s1882_s6 }
  0x35   : > { %p1891_p1 = scmp.lt.u32.totalorder %s1882_s6, %s2115_s4 }
  0x36   : > { %p1886_p5 = pneg %p1885_p3  ;;  %p1890_p2 = por %p1889_p9, %p1888_p7 }
  0x38   : > { %p1892_p4 = por %p1891_p1, %p1890_p2 }
  0x3a   : > { %p1893_p6 = pnand %p1892_p4, %p1886_p5 }
  0x3c   : > { %1896 = shalt.err (!%p1893_p6)
}
  0x3d   : > { %s1897_s27 = scalar_lea.vmem %s2121_s25, 256  ;;  %s1987_s28 = smov [#allocation3]  }
  0x3e   : > { %p1898_p8 = scmp.ne.s32.totalorder %s2121_s25, %s1897_s27  ;;  %s1902_s29 = sshll.u32 %s1987_s28, 4  ;;  %s1903_s29 = int_to_ptr.vmem [resolvable:$false] %s1902_s29 }
  0x3f   : > { %s1904_s23 = scalar_lea.vmem %s1903_s29, 512  ;;  %p1905_p3 = scmp.lt.s32.totalorder %s2121_s25, %s1903_s29 }
  0x40   : > { %p1900_p10 = pnand %p1898_p8, %p1884_p0  ;;  %p1906_p7 = scmp.lt.s32.totalorder %s1904_s23, %s1897_s27 }
  0x42   : > { %p1901_p13 = pneg %p1900_p10  ;;  %p1907_p9 = por %p1906_p7, %p1905_p3 }
  0x44   : > { %p1908_p2 = pnand %p1907_p9, %p1901_p13 }
  0x46   : > { %1911 = shalt.err (!%p1908_p2)
}
  0x47   : > { %s1988_s30 = smov 128   ;;  %s1989_s22 = smov 8  }
  0x48   : > { %1732 = dma.hbm_to_vmem [thread:$0]  (!%p2117_p11), %s2115_s4, 256, %s2121_s25, %s2123_s5, %s1988_s30, %s1988_s30, %s1989_s22  }
  0x49   : > { %p2345_p0 = scmp.ne.s32.totalorder %s2340_s20, 0 }
  0x4a   : > { %s2154_s6 = sand.u32 (!%p2345_p0), 1, %s1974_s13   ;;  %p2346_p5 = scmp.ne.s32.totalorder (!%p2345_p0), %s2338_s18, 0 }
  0x4b   : > { %171 = sbr.rel (%p2345_p0) target bundleno = 969 (0x3c9), region = 32  ;;  %s1349_s7 = sshll.u32 (!%p2345_p0), %s2154_s6, 4 }
  0x4c   : > { %s174_s8 = scalar_lea.sflag (!%p2345_p0), [#allocation4], %s2154_s6  ;;  %s177_s9 = scalar_lea.vmem (!%p2345_p0), [#allocation3], %s1349_s7 }
  0x52   : > { %1957 = dma.done.wait (%p2346_p5), %s174_s8, 256  }
  0x53   : > { %1959 = vsyncadd (%p2346_p5), %s174_s8, 4294967040  ;;  %p2347_p11 = scmp.eq.s32.totalorder %s2036_s16, 0 }
  0x55   : > { %1961 = dma.done.wait (%p2347_p11), [#allocation7], 9216   ;;  %p2348_p1 = pmov %p2347_p11 }
  0x56   : > { %v1990_v0 = vmov 0.0   ;;  %vm1991_vm0 = vmmov 0   ;;  %v1782_v1 = vld [vmem:[#allocation6] sm:$0xff]   ;;  %v1783_v2 = vld [vmem:[#allocation6 + $0x8] sm:$0xff]   ;;  %v1784_v3 = vld [vmem:[#allocation6 + $0x10] sm:$0xff]   ;;  %s203_s10 = scalar_lea.vmem [#allocation8], %s1349_s7 }
  0x57   : > { %1963 = vsyncadd (%p2348_p1), [#allocation7], 4294958080  ;;  %1517 = vmatprep.subr.bf16.mxu0 %v1990_v0  ;;  %205 = vst [vmem:[#allocation2] sm:$0x1] %v1990_v0  ;;  %1533 = vmatprep.mubr.msk.bf16.mxu0 %vm1991_vm0, %v1990_v0  ;;  %v2178_v4 = vld [vmem:[%s177_s9] sm:$0xff]  ;;  %v2180_v5 = vld [vmem:[%s177_s9 + $0x8] sm:$0xff] }
  0x58   : > { %206 = vst [vmem:[#allocation2 + $0x11] sm:$0x1] %v1990_v0  ;;  %1577 = vmatprep.subr.bf16.mxu1 %v1990_v0  ;;  %1593 = vmatprep.mubr.msk.bf16.mxu1 %vm1991_vm0, %v1990_v0  ;;  %209 = vst [vmem:[#allocation2 + $0x1] sm:$0xff] %v2178_v4  ;;  %v1785_v6 = vld [vmem:[#allocation6 + $0x18] sm:$0xff]   ;;  %v1786_v7 = vld [vmem:[#allocation6 + $0x20] sm:$0xff]   ;;  %v330_v26 = vpack.c.bf16 %v2180_v5, %v2178_v4  ;;  %s1258_s11 = sshll.u32 %s203_s10, 4  ;;  %s2281_s11 = int_to_ptr.vmem [resolvable:$true] %s1258_s11 }
  0x59   : > { %1518 = vmatpush3.bf16.msra.mxu0 %v1782_v1  ;;  %210 = vst [vmem:[#allocation2 + $0x9] sm:$0xff] %v2180_v5  ;;  %v1787_v8 = vld [vmem:[#allocation6 + $0x28] sm:$0xff]   ;;  %v1788_v9 = vld [vmem:[#allocation6 + $0x30] sm:$0xff]   ;;  %v1789_v10 = vld [vmem:[#allocation6 + $0x38] sm:$0xff]   ;;  %s1435_s27 = sshll.u32 %s2036_s16, 8  ;;  %s1245_s16 = scalar_lea.sflag [#allocation5], %s2154_s6 }
  0x5a   : > { %1519 = vmatprep.subr.bf16.mxu0 %v1990_v0  ;;  %v1806_v13 = vld [vmem:[#allocation6 + $0xc0] sm:$0xff]   ;;  %v1807_v14 = vld [vmem:[#allocation6 + $0xc8] sm:$0xff]   ;;  %v1808_v17 = vld [vmem:[#allocation6 + $0xd0] sm:$0xff]   ;;  %s2286_s23 = scalar_lea.hbm %s2334_s3, %s1435_s27  ;;  %s1912_s30 = scalar_lea.vmem %s2281_s11, 256 }
  0x5b   : > { %1578 = vmatpush3.bf16.msra.mxu1 %v1806_v13  ;;  %v1790_v16 = vld [vmem:[#allocation6 + $0x40] sm:$0xff]   ;;  %v1791_v18 = vld [vmem:[#allocation6 + $0x48] sm:$0xff]   ;;  %v1809_v19 = vld [vmem:[#allocation6 + $0xd8] sm:$0xff]   ;;  %p1913_p4 = scmp.ne.s32.totalorder %s2281_s11, %s1912_s30  ;;  %s1992_s22 = smov [#allocation8]  }
  0x5c   : > { %1579 = vmatprep.subr.bf16.mxu1 %v1990_v0  ;;  %v1792_v20 = vld [vmem:[#allocation6 + $0x50] sm:$0xff]   ;;  %v1793_v21 = vld [vmem:[#allocation6 + $0x58] sm:$0xff]   ;;  %v1794_v22 = vld [vmem:[#allocation6 + $0x60] sm:$0xff]   ;;  %s1916_s7 = sshll.u32 %s1992_s22, 4  ;;  %s1917_s7 = int_to_ptr.vmem [resolvable:$false] %s1916_s7 }
  0x5d   : > { %1520 = vmatpush3.bf16.msra.mxu0 %v1783_v2  ;;  %v1795_v23 = vld [vmem:[#allocation6 + $0x68] sm:$0xff]   ;;  %v1796_v24 = vld [vmem:[#allocation6 + $0x70] sm:$0xff]   ;;  %v1797_v25 = vld [vmem:[#allocation6 + $0x78] sm:$0xff]   ;;  %p1914_p6 = pnand %p1913_p4, %p2106_p12  ;;  %s1918_s8 = scalar_lea.vmem %s1917_s7, 512 }
  0x5e   : > { %1521 = vmatprep.subr.bf16.mxu0 %v1990_v0  ;;  %v1798_v27 = vld [vmem:[#allocation6 + $0x80] sm:$0xff]   ;;  %v1799_v28 = vld [vmem:[#allocation6 + $0x88] sm:$0xff]   ;;  %v1800_v29 = vld [vmem:[#allocation6 + $0x90] sm:$0xff]   ;;  %p1919_p10 = scmp.lt.s32.totalorder %s2281_s11, %s1917_s7  ;;  %p1920_p13 = scmp.lt.s32.totalorder %s1918_s8, %s1912_s30 }
  0x5f   : > { %v212_v11 = vld [vmem:[#allocation2] sm:$0xff]  ;;  %1580 = vmatpush3.bf16.msra.mxu1 %v1807_v14  ;;  %v1801_v30 = vld [vmem:[#allocation6 + $0x98] sm:$0xff]   ;;  %v1802_v31 = vld [vmem:[#allocation6 + $0xa0] sm:$0xff]   ;;  %p1915_p8 = pneg %p1914_p6 }
  0x60   : > { %v213_v12 = vld [vmem:[#allocation2 + $0x8] sm:$0xff]  ;;  %1581 = vmatprep.subr.bf16.mxu1 %v1990_v0  ;;  %v1803_v32 = vld [vmem:[#allocation6 + $0xa8] sm:$0xff]   ;;  %v1805_v34 = vld [vmem:[#allocation6 + $0xb8] sm:$0xff]   ;;  %p1921_p3 = por %p1920_p13, %p1919_p10 }
  0x61   : > { %1522 = vmatpush3.bf16.msra.mxu0 %v1784_v3  ;;  %v214_v15 = vpack.c.bf16 %v213_v12, %v212_v11  ;;  %v1804_v33 = vld [vmem:[#allocation6 + $0xb0] sm:$0xff]   ;;  %v1810_v38 = vld [vmem:[#allocation6 + $0xe0] sm:$0xff]   ;;  %v1811_v39 = vld [vmem:[#allocation6 + $0xe8] sm:$0xff]  }
  0x62   : > { %1523 = vmatprep.subr.bf16.mxu0 %v1990_v0  ;;  %v439_v35 = vld [vmem:[#allocation2 + $0x2] sm:$0xff]  ;;  %v440_v36 = vld [vmem:[#allocation2 + $0xa] sm:$0xff]  ;;  %v1830_v42 = vld [vmem:[#allocation6 + $0x180] sm:$0xff]   ;;  %p1922_p7 = pnand %p1921_p3, %p1915_p8 }
  0x63   : > { %1582 = vmatpush3.bf16.msra.mxu1 %v1808_v17  ;;  %v441_v37 = vpack.c.bf16 %v440_v36, %v439_v35  ;;  %v1812_v40 = vld [vmem:[#allocation6 + $0xf0] sm:$0xff]   ;;  %v1813_v41 = vld [vmem:[#allocation6 + $0xf8] sm:$0xff]   ;;  %v1832_v43 = vld [vmem:[#allocation6 + $0x188] sm:$0xff]  }
  0x64   : > { %1583 = vmatprep.subr.bf16.mxu1 %v1990_v0  ;;  %v1834_v44 = vld [vmem:[#allocation6 + $0x190] sm:$0xff]   ;;  %v1836_v45 = vld [vmem:[#allocation6 + $0x198] sm:$0xff]   ;;  %v1360_v46 = vld [vmem:[%s2333_s2] ss:$0 sm:$0xff] }
  0x65   : > { %1524 = vmatpush3.bf16.msra.mxu0 %v1785_v6  ;;  %v1814_v58 = vld [vmem:[#allocation6 + $0x100] sm:$0xff]   ;;  %v1815_v60 = vld [vmem:[#allocation6 + $0x108] sm:$0xff]   ;;  %v1816_v61 = vld [vmem:[#allocation6 + $0x110] sm:$0xff]  }
  0x66   : > { %1525 = vmatprep.subr.bf16.mxu0 %v1990_v0  ;;  %v1817_v62 = vld [vmem:[#allocation6 + $0x118] sm:$0xff]   ;;  %v1818_v63 = vld [vmem:[#allocation6 + $0x120] sm:$0xff]   ;;  %v1819_v1 = vld [vmem:[#allocation6 + $0x128] sm:$0xff]  }
  0x67   : > { %1584 = vmatpush3.bf16.msra.mxu1 %v1809_v19  ;;  %v1820_v2 = vld [vmem:[#allocation6 + $0x130] sm:$0xff]   ;;  %v1821_v3 = vld [vmem:[#allocation6 + $0x138] sm:$0xff]   ;;  %v1822_v6 = vld [vmem:[#allocation6 + $0x140] sm:$0xff]  }
  0x68   : > { %1585 = vmatprep.subr.bf16.mxu1 %v1990_v0  ;;  %v1827_v11 = vld [vmem:[#allocation6 + $0x168] sm:$0xff]   ;;  %v1828_v12 = vld [vmem:[#allocation6 + $0x170] sm:$0xff]   ;;  %v1829_v13 = vld [vmem:[#allocation6 + $0x178] sm:$0xff]  }
  0x69   : > { %1526 = vmatpush3.bf16.msra.mxu0 %v1786_v7  ;;  %v1823_v7 = vld [vmem:[#allocation6 + $0x148] sm:$0xff]   ;;  %v1835_v19 = vld [vmem:[#allocation6 + $0x1d0] sm:$0xff]  }
  0x6a   : > { %1527 = vmatprep.subr.bf16.mxu0 %v1990_v0 }
  0x6b   : > { %1586 = vmatpush3.bf16.msra.mxu1 %v1810_v38 }
  0x6c   : > { %1587 = vmatprep.subr.bf16.mxu1 %v1990_v0 }
  0x6d   : > { %1528 = vmatpush3.bf16.msra.mxu0 %v1787_v8  ;;  %v1824_v8 = vld [vmem:[#allocation6 + $0x150] sm:$0xff]  }
  0x6e   : > { %1529 = vmatprep.subr.bf16.mxu0 %v1990_v0 }
  0x6f   : > { %1588 = vmatpush3.bf16.msra.mxu1 %v1811_v39 }
  0x70   : > { %1589 = vmatprep.subr.bf16.mxu1 %v1990_v0 }
  0x71   : > { %1530 = vmatpush3.bf16.msra.mxu0 %v1788_v9  ;;  %v1825_v9 = vld [vmem:[#allocation6 + $0x158] sm:$0xff]  }
  0x72   : > { %1531 = vmatprep.subr.bf16.mxu0 %v1990_v0 }
  0x73   : > { %1590 = vmatpush3.bf16.msra.mxu1 %v1812_v40 }
  0x74   : > { %1591 = vmatprep.subr.bf16.mxu1 %v1990_v0 }
  0x75   : > { %1532 = vmatpush3.bf16.msra.mxu0 %v1789_v10  ;;  %v1826_v10 = vld [vmem:[#allocation6 + $0x160] sm:$0xff]  }
  0x76   : > { %1537 = vmatprep.subr.bf16.mxu0 %v1990_v0 }
  0x77   : > { %1592 = vmatpush3.bf16.msra.mxu1 %v1813_v41  ;;  %v1846_v41 = vld [vmem:[#allocation6 + $0x200] sm:$0xff]  }
  0x78   : > { %1534 = vmatmul.mubr.bf16.vlgmr.msra.gmra.mrb[0].mxu0 %v214_v15  ;;  %1597 = vmatprep.subr.bf16.mxu1 %v1990_v0 }
  0x79   : > { %1538 = vmatpush3.bf16.msra.mxu0 %v1790_v16  ;;  %1553 = vmatprep.mubr.msk.bf16.mxu0 %vm1991_vm0, %v1990_v0  ;;  %v1831_v16 = vld [vmem:[#allocation6 + $0x1c0] sm:$0xff]  }
  0x7a   : > { %1539 = vmatprep.subr.bf16.mxu0 %v1990_v0 }
  0x7d   : > { %1540 = vmatpush3.bf16.msra.mxu0 %v1791_v18  ;;  %v1833_v18 = vld [vmem:[#allocation6 + $0x1c8] sm:$0xff]  }
  0x7e   : > { %1541 = vmatprep.subr.bf16.mxu0 %v1990_v0 }
  0x81   : > { %1542 = vmatpush3.bf16.msra.mxu0 %v1792_v20  ;;  %v1837_v20 = vld [vmem:[#allocation6 + $0x1d8] sm:$0xff]  }
  0x82   : > { %1543 = vmatprep.subr.bf16.mxu0 %v1990_v0 }
  0x85   : > { %1544 = vmatpush3.bf16.msra.mxu0 %v1793_v21  ;;  %v1839_v21 = vld [vmem:[#allocation6 + $0x1e0] sm:$0xff]  }
  0x86   : > { %1545 = vmatprep.subr.bf16.mxu0 %v1990_v0 }
  0x89   : > { %1546 = vmatpush3.bf16.msra.mxu0 %v1794_v22  ;;  %v1841_v22 = vld [vmem:[#allocation6 + $0x1e8] sm:$0xff]  }
  0x8a   : > { %1547 = vmatprep.subr.bf16.mxu0 %v1990_v0 }
  0x8d   : > { %1548 = vmatpush3.bf16.msra.mxu0 %v1795_v23  ;;  %v1838_v23 = vld [vmem:[#allocation6 + $0x1a0] sm:$0xff]  }
  0x8e   : > { %1549 = vmatprep.subr.bf16.mxu0 %v1990_v0 }
  0x91   : > { %1550 = vmatpush3.bf16.msra.mxu0 %v1796_v24  ;;  %v1843_v24 = vld [vmem:[#allocation6 + $0x1f0] sm:$0xff]  }
  0x92   : > { %1551 = vmatprep.subr.bf16.mxu0 %v1990_v0 }
  0x95   : > { %1552 = vmatpush3.bf16.msra.mxu0 %v1797_v25  ;;  %v1840_v25 = vld [vmem:[#allocation6 + $0x1a8] sm:$0xff]  }
  0x96   : > { %1557 = vmatprep.subr.bf16.mxu0 %v1990_v0 }
  0x98   : > { %1554 = vmatmul.mubr.bf16.vlgmr.msra.gmra.mrb[0].mxu0 %v330_v26  ;;  %v1845_v26 = vld [vmem:[#allocation6 + $0x1f8] sm:$0xff]  }
  0x99   : > { %1558 = vmatpush3.bf16.msra.mxu0 %v1798_v27  ;;  %1573 = vmatprep.mubr.msk.bf16.mxu0 %vm1991_vm0, %v1990_v0  ;;  %v1842_v27 = vld [vmem:[#allocation6 + $0x1b0] sm:$0xff]  }
  0x9a   : > { %1559 = vmatprep.subr.bf16.mxu0 %v1990_v0 }
  0x9d   : > { %1560 = vmatpush3.bf16.msra.mxu0 %v1799_v28  ;;  %v1844_v28 = vld [vmem:[#allocation6 + $0x1b8] sm:$0xff]  }
  0x9e   : > { %1561 = vmatprep.subr.bf16.mxu0 %v1990_v0 }
  0xa1   : > { %1562 = vmatpush3.bf16.msra.mxu0 %v1800_v29  ;;  %v1386_v29 = vld [vmem:[%s2333_s2 + $0x1] ss:$0 sm:$0xff] }
  0xa2   : > { %1563 = vmatprep.subr.bf16.mxu0 %v1990_v0 }
  0xa5   : > { %1564 = vmatpush3.bf16.msra.mxu0 %v1801_v30 }
  0xa6   : > { %1565 = vmatprep.subr.bf16.mxu0 %v1990_v0 }
  0xa9   : > { %1566 = vmatpush3.bf16.msra.mxu0 %v1802_v31 }
  0xaa   : > { %1567 = vmatprep.subr.bf16.mxu0 %v1990_v0 }
  0xad   : > { %1568 = vmatpush3.bf16.msra.mxu0 %v1803_v32 }
  0xae   : > { %1569 = vmatprep.subr.bf16.mxu0 %v1990_v0 }
  0xb1   : > { %1570 = vmatpush3.bf16.msra.mxu0 %v1804_v33 }
  0xb2   : > { %1571 = vmatprep.subr.bf16.mxu0 %v1990_v0 }
  0xb5   : > { %1572 = vmatpush3.bf16.msra.mxu0 %v1805_v34 }
  0xb6   : > { %1637 = vmatprep.subr.bf16.mxu0 %v1990_v0 }
  0xb8   : > { %1574 = vmatmul.mubr.bf16.vlgmr.msra.gmra.mrb[0].mxu0 %v441_v37 }
  0xb9   : > { %1653 = vmatprep.mubr.msk.bf16.mxu0 %vm1991_vm0, %v1990_v0  ;;  %1638 = vmatpush3.bf16.msra.mxu0 %v1830_v42 }
  0xba   : > { %1639 = vmatprep.subr.bf16.mxu0 %v1990_v0 }
  0xbd   : > { %1640 = vmatpush3.bf16.msra.mxu0 %v1832_v43  ;;  %v1847_v43 = vld [vmem:[#allocation6 + $0x208] sm:$0xff]  }
  0xbe   : > { %1641 = vmatprep.subr.bf16.mxu0 %v1990_v0 }
  0xc1   : > { %1642 = vmatpush3.bf16.msra.mxu0 %v1834_v44  ;;  %v1848_v44 = vld [vmem:[#allocation6 + $0x210] sm:$0xff]  }
  0xc2   : > { %1643 = vmatprep.subr.bf16.mxu0 %v1990_v0 }
  0xc5   : > { %1644 = vmatpush3.bf16.msra.mxu0 %v1836_v45  ;;  %v1849_v45 = vld [vmem:[#allocation6 + $0x218] sm:$0xff]  }
  0xc6   : > { %1645 = vmatprep.subr.bf16.mxu0 %v1990_v0 }
  0xc9   : > { %1646 = vmatpush3.bf16.msra.mxu0 %v1838_v23 }
  0xca   : > { %1647 = vmatprep.subr.bf16.mxu0 %v1990_v0 }
  0xcd   : > { %1648 = vmatpush3.bf16.msra.mxu0 %v1840_v25 }
  0xce   : > { %1649 = vmatprep.subr.bf16.mxu0 %v1990_v0 }
  0xd1   : > { %1650 = vmatpush3.bf16.msra.mxu0 %v1842_v27 }
  0xd2   : > { %1651 = vmatprep.subr.bf16.mxu0 %v1990_v0 }
  0xd5   : > { %1652 = vmatpush3.bf16.msra.mxu0 %v1844_v28 }
  0xd6   : > { %1677 = vmatprep.subr.bf16.mxu0 %v1990_v0 }
 0x18b   : > { %v541_v47 = vpop.f32.mrb[0].mxu0 }
 0x18c   : > { %v1697_v48 = vadd.f32 %v1360_v46, %v541_v47  ;;  %v1575_v49 = vpop.f32.mrb[1].mxu0  ;;  %v1851_v47 = vld [vmem:[#allocation6 + $0x228] sm:$0xff]  }
 0x18d   : > { %v544_v50 = vpop.f32.mrb[2].mxu0  ;;  %v1853_v49 = vld [vmem:[#allocation6 + $0x238] sm:$0xff]  }
 0x18e   : > { %v550_v51 = vmax.f32 %v1697_v48, 0.0  ;;  %v1698_v52 = vadd.f32 %v1360_v46, %v544_v50  ;;  %v1576_v53 = vpop.f32.mrb[3].mxu0  ;;  %v1850_v46 = vld [vmem:[#allocation6 + $0x220] sm:$0xff]   ;;  %v1852_v48 = vld [vmem:[#allocation6 + $0x230] sm:$0xff]  }
 0x190   : > { %552 = vst [vmem:[#allocation2 + $0x1] sm:$0xff] %v550_v51  ;;  %v551_v54 = vmax.f32 %v1698_v52, 0.0 }
 0x192   : > { %553 = vst [vmem:[#allocation2 + $0x9] sm:$0xff] %v551_v54  ;;  %v675_v55 = vpack.c.bf16 %v551_v54, %v550_v51 }
 0x197   : > { %v556_v56 = vld [vmem:[#allocation2] sm:$0xff] }
 0x199   : > { %v557_v57 = vld [vmem:[#allocation2 + $0x8] sm:$0xff] }
 0x19a   : > { %v558_v59 = vpack.c.bf16 %v557_v57, %v556_v56  ;;  %v784_v14 = vld [vmem:[#allocation2 + $0x2] sm:$0xff]  ;;  %v785_v15 = vld [vmem:[#allocation2 + $0xa] sm:$0xff] }
 0x19b   : > { %v786_v17 = vpack.c.bf16 %v785_v15, %v784_v14  ;;  %v1412_v57 = vld [vmem:[%s2333_s2 + $0x2] ss:$0 sm:$0xff] }
 0x19c   : > { %1594 = vmatmul.mubr.bf16.vlgmr.msra.gmra.mrb[0].mxu1 %v558_v59 }
 0x19d   : > { %1598 = vmatpush3.bf16.msra.mxu1 %v1814_v58  ;;  %1613 = vmatprep.mubr.msk.bf16.mxu1 %vm1991_vm0, %v1990_v0 }
 0x19e   : > { %1599 = vmatprep.subr.bf16.mxu1 %v1990_v0 }
 0x1a1   : > { %1600 = vmatpush3.bf16.msra.mxu1 %v1815_v60 }
 0x1a2   : > { %1601 = vmatprep.subr.bf16.mxu1 %v1990_v0 }
 0x1a5   : > { %1602 = vmatpush3.bf16.msra.mxu1 %v1816_v61 }
 0x1a6   : > { %1603 = vmatprep.subr.bf16.mxu1 %v1990_v0 }
 0x1a9   : > { %1604 = vmatpush3.bf16.msra.mxu1 %v1817_v62 }
 0x1aa   : > { %1605 = vmatprep.subr.bf16.mxu1 %v1990_v0 }
 0x1ad   : > { %1606 = vmatpush3.bf16.msra.mxu1 %v1818_v63 }
 0x1ae   : > { %1607 = vmatprep.subr.bf16.mxu1 %v1990_v0 }
 0x1b1   : > { %1608 = vmatpush3.bf16.msra.mxu1 %v1819_v1 }
 0x1b2   : > { %1609 = vmatprep.subr.bf16.mxu1 %v1990_v0 }
 0x1b5   : > { %1610 = vmatpush3.bf16.msra.mxu1 %v1820_v2 }
 0x1b6   : > { %1611 = vmatprep.subr.bf16.mxu1 %v1990_v0 }
 0x1b9   : > { %1612 = vmatpush3.bf16.msra.mxu1 %v1821_v3 }
 0x1ba   : > { %1617 = vmatprep.subr.bf16.mxu1 %v1990_v0 }
 0x1bc   : > { %1614 = vmatmul.mubr.bf16.vlgmr.msra.gmra.mrb[0].mxu1 %v675_v55 }
 0x1bd   : > { %1618 = vmatpush3.bf16.msra.mxu1 %v1822_v6  ;;  %1633 = vmatprep.mubr.msk.bf16.mxu1 %vm1991_vm0, %v1990_v0 }
 0x1be   : > { %1619 = vmatprep.subr.bf16.mxu1 %v1990_v0 }
 0x1c1   : > { %1620 = vmatpush3.bf16.msra.mxu1 %v1823_v7 }
 0x1c2   : > { %1621 = vmatprep.subr.bf16.mxu1 %v1990_v0 }
 0x1c5   : > { %1622 = vmatpush3.bf16.msra.mxu1 %v1824_v8 }
 0x1c6   : > { %1623 = vmatprep.subr.bf16.mxu1 %v1990_v0 }
 0x1c9   : > { %1624 = vmatpush3.bf16.msra.mxu1 %v1825_v9 }
 0x1ca   : > { %1625 = vmatprep.subr.bf16.mxu1 %v1990_v0 }
 0x1cd   : > { %1626 = vmatpush3.bf16.msra.mxu1 %v1826_v10 }
 0x1ce   : > { %1627 = vmatprep.subr.bf16.mxu1 %v1990_v0 }
 0x1d1   : > { %1628 = vmatpush3.bf16.msra.mxu1 %v1827_v11 }
 0x1d2   : > { %1629 = vmatprep.subr.bf16.mxu1 %v1990_v0 }
 0x1d5   : > { %1630 = vmatpush3.bf16.msra.mxu1 %v1828_v12 }
 0x1d6   : > { %1631 = vmatprep.subr.bf16.mxu1 %v1990_v0 }
 0x1d9   : > { %1632 = vmatpush3.bf16.msra.mxu1 %v1829_v13 }
 0x1da   : > { %1657 = vmatprep.subr.bf16.mxu1 %v1990_v0 }
 0x1dc   : > { %1634 = vmatmul.mubr.bf16.vlgmr.msra.gmra.mrb[0].mxu1 %v786_v17 }
 0x1dd   : > { %1658 = vmatpush3.bf16.msra.mxu1 %v1831_v16  ;;  %1673 = vmatprep.mubr.msk.bf16.mxu1 %vm1991_vm0, %v1990_v0 }
 0x1de   : > { %1659 = vmatprep.subr.bf16.mxu1 %v1990_v0 }
 0x1e1   : > { %1660 = vmatpush3.bf16.msra.mxu1 %v1833_v18 }
 0x1e2   : > { %1661 = vmatprep.subr.bf16.mxu1 %v1990_v0 }
 0x1e5   : > { %1662 = vmatpush3.bf16.msra.mxu1 %v1835_v19 }
 0x1e6   : > { %1663 = vmatprep.subr.bf16.mxu1 %v1990_v0 }
 0x1e9   : > { %1664 = vmatpush3.bf16.msra.mxu1 %v1837_v20 }
 0x1ea   : > { %1665 = vmatprep.subr.bf16.mxu1 %v1990_v0 }
 0x1ed   : > { %1666 = vmatpush3.bf16.msra.mxu1 %v1839_v21 }
 0x1ee   : > { %1667 = vmatprep.subr.bf16.mxu1 %v1990_v0 }
 0x1f1   : > { %1668 = vmatpush3.bf16.msra.mxu1 %v1841_v22 }
 0x1f2   : > { %1669 = vmatprep.subr.bf16.mxu1 %v1990_v0 }
 0x1f5   : > { %1670 = vmatpush3.bf16.msra.mxu1 %v1843_v24 }
 0x1f6   : > { %1671 = vmatprep.subr.bf16.mxu1 %v1990_v0 }
 0x1f9   : > { %1672 = vmatpush3.bf16.msra.mxu1 %v1845_v26 }
 0x2af   : > { %v886_v30 = vpop.f32.mrb[0].mxu1 }
 0x2b0   : > { %v1699_v31 = vadd.f32 %v1386_v29, %v886_v30  ;;  %v1635_v32 = vpop.f32.mrb[1].mxu1 }
 0x2b1   : > { %v889_v33 = vpop.f32.mrb[2].mxu1 }
 0x2b2   : > { %v895_v34 = vmax.f32 %v1699_v31, 0.0  ;;  %v1700_v35 = vadd.f32 %v1386_v29, %v889_v33  ;;  %v1636_v36 = vpop.f32.mrb[3].mxu1 }
 0x2b4   : > { %897 = vst [vmem:[#allocation2 + $0x1] sm:$0xff] %v895_v34  ;;  %v896_v37 = vmax.f32 %v1700_v35, 0.0 }
 0x2b6   : > { %898 = vst [vmem:[#allocation2 + $0x9] sm:$0xff] %v896_v37  ;;  %v1020_v38 = vpack.c.bf16 %v896_v37, %v895_v34 }
 0x2b8   : > { %1674 = vmatmul.mubr.bf16.vlgmr.msra.gmra.mrb[4].mxu1 %v1020_v38 }
 0x2bb   : > { %v901_v39 = vld [vmem:[#allocation2] sm:$0xff] }
 0x2bd   : > { %v902_v40 = vld [vmem:[#allocation2 + $0x8] sm:$0xff] }
 0x2be   : > { %v903_v42 = vpack.c.bf16 %v902_v40, %v901_v39  ;;  %v1129_v50 = vld [vmem:[#allocation2 + $0x2] sm:$0xff]  ;;  %v1130_v51 = vld [vmem:[#allocation2 + $0xa] sm:$0xff] }
 0x2bf   : > { %v1131_v52 = vpack.c.bf16 %v1130_v51, %v1129_v50 }
 0x2c0   : > { %1654 = vmatmul.mubr.bf16.vlgmr.msra.gmra.mrb[4].mxu0 %v903_v42 }
 0x2c1   : > { %1678 = vmatpush3.bf16.msra.mxu0 %v1846_v41  ;;  %1693 = vmatprep.mubr.msk.bf16.mxu0 %vm1991_vm0, %v1990_v0 }
 0x2c2   : > { %1679 = vmatprep.subr.bf16.mxu0 %v1990_v0 }
 0x2c5   : > { %1680 = vmatpush3.bf16.msra.mxu0 %v1847_v43 }
 0x2c6   : > { %1681 = vmatprep.subr.bf16.mxu0 %v1990_v0 }
 0x2c9   : > { %1682 = vmatpush3.bf16.msra.mxu0 %v1848_v44 }
 0x2ca   : > { %1683 = vmatprep.subr.bf16.mxu0 %v1990_v0 }
 0x2cd   : > { %1684 = vmatpush3.bf16.msra.mxu0 %v1849_v45 }
 0x2ce   : > { %1685 = vmatprep.subr.bf16.mxu0 %v1990_v0 }
 0x2d1   : > { %1686 = vmatpush3.bf16.msra.mxu0 %v1850_v46 }
 0x2d2   : > { %1687 = vmatprep.subr.bf16.mxu0 %v1990_v0 }
 0x2d5   : > { %1688 = vmatpush3.bf16.msra.mxu0 %v1851_v47 }
 0x2d6   : > { %1689 = vmatprep.subr.bf16.mxu0 %v1990_v0 }
 0x2d9   : > { %1690 = vmatpush3.bf16.msra.mxu0 %v1852_v48 }
 0x2da   : > { %1691 = vmatprep.subr.bf16.mxu0 %v1990_v0 }
 0x2dd   : > { %1692 = vmatpush3.bf16.msra.mxu0 %v1853_v49 }
 0x2e0   : > { %1694 = vmatmul.mubr.bf16.vlgmr.msra.gmra.mrb[8].mxu0 %v1131_v52 }
 0x38b   : > { %v1120_v53 = vpop.f32.mrb[4].mxu1 }
 0x38c   : > { %v1675_v54 = vpop.f32.mrb[5].mxu1 }
 0x38d   : > { %v1123_v55 = vpop.f32.mrb[6].mxu1 }
 0x38e   : > { %v1676_v56 = vpop.f32.mrb[7].mxu1 }
 0x393   : > { %v1003_v58 = vpop.f32.mrb[4].mxu0 }
 0x394   : > { %v1016_v59 = vadd.f32 %v1412_v57, %v1003_v58  ;;  %v1655_v60 = vpop.f32.mrb[5].mxu0 }
 0x395   : > { %v1006_v61 = vpop.f32.mrb[6].mxu0 }
 0x396   : > { %v1127_v0 = vadd.f32 %v1120_v53, %v1016_v59  ;;  %v1017_v62 = vadd.f32 %v1412_v57, %v1006_v61  ;;  %v1656_v63 = vpop.f32.mrb[7].mxu0 }
 0x398   : > { %v1128_v1 = vadd.f32 %v1123_v55, %v1017_v62 }
 0x3b3   : > { %v1231_v2 = vpop.f32.mrb[8].mxu0 }
 0x3b4   : > { %v1238_v3 = vadd.f32 %v1231_v2, %v1127_v0  ;;  %v1695_v6 = vpop.f32.mrb[9].mxu0 }
 0x3b5   : > { %v1234_v7 = vpop.f32.mrb[10].mxu0 }
 0x3b6   : > { %v1240_v8 = vadd.f32 %v1238_v3, %v2178_v4  ;;  %v1239_v9 = vadd.f32 %v1234_v7, %v1128_v1  ;;  %v1696_v10 = vpop.f32.mrb[11].mxu0 }
 0x3b8   : > { %1242 = vst [vmem:[%s203_s10] sm:$0xff] %v1240_v8  ;;  %v1241_v11 = vadd.f32 %v1239_v9, %v2180_v5 }
 0x3ba   : > { %1243 = vst [vmem:[%s203_s10 + $0x8] sm:$0xff] %v1241_v11 }
 0x3bb   : > { %1925 = shalt.err (!%p1922_p7)
}
 0x3bc   : > { %s1926_s9 = scalar_lea.hbm %s2286_s23, 256  ;;  %s1930_s4 = scalar_lea.hbm %s2334_s3, 512 }
 0x3bd   : > { %p1927_p9 = scmp.ne.s32.totalorder %s2286_s23, %s1926_s9  ;;  %p1931_p5 = scmp.lt.u32.totalorder %s2286_s23, %s2334_s3 }
 0x3be   : > { %p1932_p11 = scmp.lt.u32.totalorder %s1930_s4, %s1926_s9  ;;  %p1934_p4 = scmp.lt.u32.totalorder %s1926_s9, %s2286_s23 }
 0x3bf   : > { %p1928_p2 = pnand %p1927_p9, %p2106_p12 }
 0x3c0   : > { %p1933_p1 = por %p1932_p11, %p1931_p5 }
 0x3c1   : > { %p1929_p0 = pneg %p1928_p2 }
 0x3c2   : > { %p1935_p6 = por %p1934_p4, %p1933_p1 }
 0x3c4   : > { %p1936_p8 = pnand %p1935_p6, %p1929_p0 }
 0x3c6   : > { %1939 = shalt.err (!%p1936_p8)
}
 0x3c7   : > { %s1993_s5 = smov 128   ;;  %s1994_s10 = smov 8  }
 0x3c8   : > { %1723 = dma.vmem_to_hbm [thread:$0]  (%p2106_p12), %s2281_s11, 256, %s2286_s23, %s1245_s16, %s1993_s5, %s1993_s5, %s1994_s10  }
 0x3c9 PF: > { %s1273_s27 = sand.u32 1, %s1970_s12   ;;  %p2349_p10 = scmp.ne.s32.totalorder %s2339_s19, 0 }
 0x3ca   : > { %p2350_p13 = scmp.ge.s32.totalorder %s1982_s15, 2  ;;  %s1274_s28 = scalar_lea.sflag [#allocation5], %s1273_s27 }
 0x3cc   : > { %p1734_p3 = pnand %p2350_p13, %p2349_p10 }
 0x3ce   : > { %1965 = dma.done.wait (!%p1734_p3), %s1274_s28, 256  }
 0x3cf   : > { %1967 = vsyncadd (!%p1734_p3), %s1274_s28, 4294967040  ;;  %p17_p7 = scmp.ge.s32.totalorder %s2071_s24, 4   ;;  %s2351_s12 = smov %s1974_s13 }
 0x3d0   : > { %s2352_s13 = smov %s1978_s14  ;;  %s2353_s14 = smov %s2102_s17 }
 0x3d1   : > { %s2354_s15 = smov %s2071_s24  ;;  %19 = sbr.rel (!%p17_p7) target bundleno = 6 (0x6), region = 91 }
 0x3d8   :  { %1279 = vsyncpa [#allocation4], 1 }
 0x3d9   :  { %1281 = vsyncpa [#allocation4 + $0x1], 1 }
 0x3da   :  { %1282 = vsyncpa [#allocation7], 1 }
 0x3db   :  { %1283 = vsyncpa [#allocation5], 1 }
 0x3dc   :  { %1285 = vsyncpa [#allocation5 + $0x1], 1 }

// kernel: tpu_custom_call.1
= control target key start
LH: loop header
LB: loop body
LE: loop exit
PB: predicated region body
PF: predicated region fallthrough
CT: control target
= control target key end

     0   :  { %8 = vsyncpa [#allocation4], 0  ;;  %s2331_s0 = inlined_call_operand.hbm [shape: f32[2,16,128], index: 0, kind: input, shape index: {}]   ;;  %s2332_s1 = inlined_call_operand.hbm [shape: bf16[3,3,128,128], index: 1, kind: input, shape index: {}]   ;;  %s2333_s2 = inlined_call_operand.vmem [shape: f32[3,1,128], index: 2, kind: input, shape index: {}]   ;;  %s2334_s3 = inlined_call_operand.hbm [shape: f32[2,16,128], index: 3, kind: output, shape index: {}]  }
   0x1   :  { %10 = vsyncpa [#allocation4 + $0x1], 0 }
   0x2   :  { %11 = vsyncpa [#allocation7], 0 }
   0x3   :  { %12 = vsyncpa [#allocation5], 0 }
   0x4   :  { %14 = vsyncpa [#allocation5 + $0x1], 0  ;;  %s2015_s12 = smov 0   ;;  %s2017_s13 = smov 0  }
   0x5   :  { %s2019_s14 = smov 0   ;;  %s2021_s15 = smov 0  }
   0x6 LB: > { %s2036_s16 = sadd.s32 4294967295, %s1982_s15   ;;  %s1341_s17 = sadd.s32 4294967294, %s1982_s15   ;;  %s1982_s15 = sphi %s2021_s15, %s2354_s15   ;;  %s1978_s14 = sphi %s2019_s14, %s2353_s14   ;;  %s1974_s13 = sphi %s2017_s13, %s2352_s13   ;;  %s1970_s12 = sphi %s2015_s12, %s2351_s12  }
   0x7   : > { %p40_p0 = scmp.ne.s32.totalorder %s1974_s13, %s1970_s12  ;;  %p2335_p1 = scmp.eq.s32.totalorder %s2036_s16, 0 }
   0x8   : > { %p112_p3 = scmp.eq.s32.totalorder %s1341_s17, 1  ;;  %p1342_p5 = scmp.ge.s32.totalorder %s1982_s15, 1 }
   0x9   : > { %p2045_p4 = por %p2335_p1, %p40_p0  ;;  %p119_p7 = scmp.lt.s32.totalorder %s1982_s15, 3 }
   0xa   : > { %p2050_p6 = por %p112_p3, %p40_p0  ;;  %s1984_s21 = smov [#allocation6]  }
   0xb   : > { %s2338_s18 = scalar_select %p2045_p4, 1, 0 }
   0xc   : > { %s2339_s19 = scalar_select %p2050_p6, 1, 0 }
   0xd   : > { %p2055_p8 = pnand %p1342_p5, %p119_p7  ;;  %s131_s22 = sshll.u32 %s1984_s21, 4  ;;  %s2059_s22 = int_to_ptr.vmem [resolvable:$true] %s131_s22 }
   0xe   : > { %s2071_s24 = sadd.s32 1, %s1982_s15   ;;  %s27_s25 = sadd.s32 1, %s1978_s14 }
   0xf   : > { %s2340_s20 = scalar_select %p2055_p8, 1, 0 }
  0x10   : > { %p1725_p9 = pneg %p2055_p8  ;;  %s24_s26 = ssub.s32 %s1982_s15, %s2071_s24 }
  0x11   : > { %s1854_s29 = scalar_lea.hbm %s2332_s1, 9216 }
  0x12   : > { %p2066_p11 = pnand %p1725_p9, %p2335_p1  ;;  %p1855_p12 = scmp.ne.s32.totalorder %s2332_s1, %s1854_s29 }
  0x13   : > { %p1861_p5 = scmp.lt.u32.totalorder %s1854_s29, %s2332_s1 }
  0x14   : > { %p1856_p13 = pneg %p2066_p11 }
  0x16   : > { %p1857_p0 = pnand %p1856_p13, %p1855_p12 }
  0x18   : > { %p1858_p3 = pneg %p1857_p0 }
  0x1a   : > { %p1863_p7 = pnand %p1861_p5, %p1858_p3 }
  0x1c   : > { %1866 = shalt.err (!%p1863_p7)
}
  0x1d   : > { %s1867_s7 = scalar_lea.vmem %s2059_s22, 9216  ;;  %p1875_p2 = scmp.lt.s32.totalorder %s2059_s22, %s2059_s22 }
  0x1e   : > { %p1868_p9 = scmp.ne.s32.totalorder %s2059_s22, %s1867_s7  ;;  %p1876_p6 = scmp.lt.s32.totalorder %s1867_s7, %s1867_s7 }
  0x20   : > { %p1870_p10 = pnand %p1868_p9, %p1856_p13  ;;  %p1877_p4 = por %p1876_p6, %p1875_p2 }
  0x22   : > { %p1871_p1 = pneg %p1870_p10 }
  0x24   : > { %p1878_p8 = pnand %p1877_p4, %p1871_p1 }
  0x26   : > { %1881 = shalt.err (!%p1878_p8)
}
  0x27   : > { %s1985_s8 = smov 64   ;;  %s1986_s9 = smov 4  }
  0x28   : > { %1728 = dma.hbm_to_vmem [thread:$0]  (!%p2066_p11), %s2332_s1, 9216, %s2059_s22, [#allocation7], %s1985_s8, %s1985_s8, %s1986_s9  }
  0x29   : > { %p25_p2 = scmp.eq.s32.totalorder %s24_s26, 0  ;;  %p34_p1 = scmp.ne.s32.totalorder %s1978_s14, %s1974_s13 }
  0x2a   : > { %p35_p4 = scmp.eq.s32.totalorder %s1982_s15, 0  ;;  %p1738_p6 = scmp.lt.s32.totalorder %s1982_s15, 2 }
  0x2b   : > { %s2102_s17 = scalar_select %p25_p2, %s1978_s14, %s27_s25  }
  0x2c   : > { %p36_p8 = por %p35_p4, %p34_p1  ;;  %p2342_p10 = scmp.eq.s32.totalorder %s2036_s16, 1 }
  0x2d   : > { %s148_s27 = sand.u32 1, %s1978_s14   ;;  %s1434_s28 = sshll.u32 %s1982_s15, 8 }
  0x2e   : > { %p2106_p12 = por %p2342_p10, %p34_p1  ;;  %s1345_s29 = sshll.u32 %s148_s27, 4 }
  0x2f   : > { %s2115_s4 = scalar_lea.hbm %s2331_s0, %s1434_s28  ;;  %s152_s22 = scalar_lea.vmem [#allocation3], %s1345_s29 }
  0x30   : > { %s159_s25 = sshll.u32 %s152_s22, 4  ;;  %p2117_p11 = pnand %p1738_p6, %p36_p8  ;;  %s2121_s25 = int_to_ptr.vmem [resolvable:$true] %s159_s25 }
  0x31   : > { %s2123_s5 = scalar_lea.sflag [#allocation4], %s148_s27  ;;  %s1882_s6 = scalar_lea.hbm %s2115_s4, 256 }
  0x32   : > { %p1883_p13 = scmp.ne.s32.totalorder %s2115_s4, %s1882_s6  ;;  %p1884_p0 = pneg %p2117_p11 }
  0x33   : > { %s1887_s9 = scalar_lea.hbm %s2331_s0, 512  ;;  %p1888_p7 = scmp.lt.u32.totalorder %s2115_s4, %s2331_s0 }
  0x34   : > { %p1885_p3 = pnand %p1884_p0, %p1883_p13  ;;  %p1889_p9 = scmp.lt.u32.totalorder %s1887_s9, %s1882_s6 }
  0x35   : > { %p1891_p1 = scmp.lt.u32.totalorder %s1882_s6, %s2115_s4 }
  0x36   : > { %p1886_p5 = pneg %p1885_p3  ;;  %p1890_p2 = por %p1889_p9, %p1888_p7 }
  0x38   : > { %p1892_p4 = por %p1891_p1, %p1890_p2 }
  0x3a   : > { %p1893_p6 = pnand %p1892_p4, %p1886_p5 }
  0x3c   : > { %1896 = shalt.err (!%p1893_p6)
}
  0x3d   : > { %s1897_s27 = scalar_lea.vmem %s2121_s25, 256  ;;  %s1987_s28 = smov [#allocation3]  }
  0x3e   : > { %p1898_p8 = scmp.ne.s32.totalorder %s2121_s25, %s1897_s27  ;;  %s1902_s29 = sshll.u32 %s1987_s28, 4  ;;  %s1903_s29 = int_to_ptr.vmem [resolvable:$false] %s1902_s29 }
  0x3f   : > { %s1904_s23 = scalar_lea.vmem %s1903_s29, 512  ;;  %p1905_p3 = scmp.lt.s32.totalorder %s2121_s25, %s1903_s29 }
  0x40   : > { %p1900_p10 = pnand %p1898_p8, %p1884_p0  ;;  %p1906_p7 = scmp.lt.s32.totalorder %s1904_s23, %s1897_s27 }
  0x42   : > { %p1901_p13 = pneg %p1900_p10  ;;  %p1907_p9 = por %p1906_p7, %p1905_p3 }
  0x44   : > { %p1908_p2 = pnand %p1907_p9, %p1901_p13 }
  0x46   : > { %1911 = shalt.err (!%p1908_p2)
}
  0x47   : > { %s1988_s30 = smov 128   ;;  %s1989_s22 = smov 8  }
  0x48   : > { %1732 = dma.hbm_to_vmem [thread:$0]  (!%p2117_p11), %s2115_s4, 256, %s2121_s25, %s2123_s5, %s1988_s30, %s1988_s30, %s1989_s22  }
  0x49   : > { %p2345_p0 = scmp.ne.s32.totalorder %s2340_s20, 0 }
  0x4a   : > { %s2154_s6 = sand.u32 (!%p2345_p0), 1, %s1974_s13   ;;  %p2346_p5 = scmp.ne.s32.totalorder (!%p2345_p0), %s2338_s18, 0 }
  0x4b   : > { %171 = sbr.rel (%p2345_p0) target bundleno = 969 (0x3c9), region = 32  ;;  %s1349_s7 = sshll.u32 (!%p2345_p0), %s2154_s6, 4 }
  0x4c   : > { %s174_s8 = scalar_lea.sflag (!%p2345_p0), [#allocation4], %s2154_s6  ;;  %s177_s9 = scalar_lea.vmem (!%p2345_p0), [#allocation3], %s1349_s7 }
  0x52   : > { %1957 = dma.done.wait (%p2346_p5), %s174_s8, 256  }
  0x53   : > { %1959 = vsyncadd (%p2346_p5), %s174_s8, 4294967040  ;;  %p2347_p11 = scmp.eq.s32.totalorder %s2036_s16, 0 }
  0x55   : > { %1961 = dma.done.wait (%p2347_p11), [#allocation7], 9216   ;;  %p2348_p1 = pmov %p2347_p11 }
  0x56   : > { %v1990_v0 = vmov 0.0   ;;  %vm1991_vm0 = vmmov 0   ;;  %v1782_v1 = vld [vmem:[#allocation6] sm:$0xff]   ;;  %v1783_v2 = vld [vmem:[#allocation6 + $0x8] sm:$0xff]   ;;  %v1784_v3 = vld [vmem:[#allocation6 + $0x10] sm:$0xff]   ;;  %s203_s10 = scalar_lea.vmem [#allocation8], %s1349_s7 }
  0x57   : > { %1963 = vsyncadd (%p2348_p1), [#allocation7], 4294958080  ;;  %1517 = vmatprep.subr.bf16.mxu0 %v1990_v0  ;;  %205 = vst [vmem:[#allocation2] sm:$0x1] %v1990_v0  ;;  %1533 = vmatprep.mubr.msk.bf16.mxu0 %vm1991_vm0, %v1990_v0  ;;  %v2178_v4 = vld [vmem:[%s177_s9] sm:$0xff]  ;;  %v2180_v5 = vld [vmem:[%s177_s9 + $0x8] sm:$0xff] }
  0x58   : > { %206 = vst [vmem:[#allocation2 + $0x11] sm:$0x1] %v1990_v0  ;;  %1577 = vmatprep.subr.bf16.mxu1 %v1990_v0  ;;  %1593 = vmatprep.mubr.msk.bf16.mxu1 %vm1991_vm0, %v1990_v0  ;;  %209 = vst [vmem:[#allocation2 + $0x1] sm:$0xff] %v2178_v4  ;;  %v1785_v6 = vld [vmem:[#allocation6 + $0x18] sm:$0xff]   ;;  %v1786_v7 = vld [vmem:[#allocation6 + $0x20] sm:$0xff]   ;;  %v330_v26 = vpack.c.bf16 %v2180_v5, %v2178_v4  ;;  %s1258_s11 = sshll.u32 %s203_s10, 4  ;;  %s2281_s11 = int_to_ptr.vmem [resolvable:$true] %s1258_s11 }
  0x59   : > { %1518 = vmatpush3.bf16.msra.mxu0 %v1782_v1  ;;  %210 = vst [vmem:[#allocation2 + $0x9] sm:$0xff] %v2180_v5  ;;  %v1787_v8 = vld [vmem:[#allocation6 + $0x28] sm:$0xff]   ;;  %v1788_v9 = vld [vmem:[#allocation6 + $0x30] sm:$0xff]   ;;  %v1789_v10 = vld [vmem:[#allocation6 + $0x38] sm:$0xff]   ;;  %s1435_s27 = sshll.u32 %s2036_s16, 8  ;;  %s1245_s16 = scalar_lea.sflag [#allocation5], %s2154_s6 }
  0x5a   : > { %1519 = vmatprep.subr.bf16.mxu0 %v1990_v0  ;;  %v1806_v13 = vld [vmem:[#allocation6 + $0xc0] sm:$0xff]   ;;  %v1807_v14 = vld [vmem:[#allocation6 + $0xc8] sm:$0xff]   ;;  %v1808_v17 = vld [vmem:[#allocation6 + $0xd0] sm:$0xff]   ;;  %s2286_s23 = scalar_lea.hbm %s2334_s3, %s1435_s27  ;;  %s1912_s30 = scalar_lea.vmem %s2281_s11, 256 }
  0x5b   : > { %1578 = vmatpush3.bf16.msra.mxu1 %v1806_v13  ;;  %v1790_v16 = vld [vmem:[#allocation6 + $0x40] sm:$0xff]   ;;  %v1791_v18 = vld [vmem:[#allocation6 + $0x48] sm:$0xff]   ;;  %v1809_v19 = vld [vmem:[#allocation6 + $0xd8] sm:$0xff]   ;;  %p1913_p4 = scmp.ne.s32.totalorder %s2281_s11, %s1912_s30  ;;  %s1992_s22 = smov [#allocation8]  }
  0x5c   : > { %1579 = vmatprep.subr.bf16.mxu1 %v1990_v0  ;;  %v1792_v20 = vld [vmem:[#allocation6 + $0x50] sm:$0xff]   ;;  %v1793_v21 = vld [vmem:[#allocation6 + $0x58] sm:$0xff]   ;;  %v1794_v22 = vld [vmem:[#allocation6 + $0x60] sm:$0xff]   ;;  %s1916_s7 = sshll.u32 %s1992_s22, 4  ;;  %s1917_s7 = int_to_ptr.vmem [resolvable:$false] %s1916_s7 }
  0x5d   : > { %1520 = vmatpush3.bf16.msra.mxu0 %v1783_v2  ;;  %v1795_v23 = vld [vmem:[#allocation6 + $0x68] sm:$0xff]   ;;  %v1796_v24 = vld [vmem:[#allocation6 + $0x70] sm:$0xff]   ;;  %v1797_v25 = vld [vmem:[#allocation6 + $0x78] sm:$0xff]   ;;  %p1914_p6 = pnand %p1913_p4, %p2106_p12  ;;  %s1918_s8 = scalar_lea.vmem %s1917_s7, 512 }
  0x5e   : > { %1521 = vmatprep.subr.bf16.mxu0 %v1990_v0  ;;  %v1798_v27 = vld [vmem:[#allocation6 + $0x80] sm:$0xff]   ;;  %v1799_v28 = vld [vmem:[#allocation6 + $0x88] sm:$0xff]   ;;  %v1800_v29 = vld [vmem:[#allocation6 + $0x90] sm:$0xff]   ;;  %p1919_p10 = scmp.lt.s32.totalorder %s2281_s11, %s1917_s7  ;;  %p1920_p13 = scmp.lt.s32.totalorder %s1918_s8, %s1912_s30 }
  0x5f   : > { %v212_v11 = vld [vmem:[#allocation2] sm:$0xff]  ;;  %1580 = vmatpush3.bf16.msra.mxu1 %v1807_v14  ;;  %v1801_v30 = vld [vmem:[#allocation6 + $0x98] sm:$0xff]   ;;  %v1802_v31 = vld [vmem:[#allocation6 + $0xa0] sm:$0xff]   ;;  %p1915_p8 = pneg %p1914_p6 }
  0x60   : > { %v213_v12 = vld [vmem:[#allocation2 + $0x8] sm:$0xff]  ;;  %1581 = vmatprep.subr.bf16.mxu1 %v1990_v0  ;;  %v1803_v32 = vld [vmem:[#allocation6 + $0xa8] sm:$0xff]   ;;  %v1805_v34 = vld [vmem:[#allocation6 + $0xb8] sm:$0xff]   ;;  %p1921_p3 = por %p1920_p13, %p1919_p10 }
  0x61   : > { %1522 = vmatpush3.bf16.msra.mxu0 %v1784_v3  ;;  %v214_v15 = vpack.c.bf16 %v213_v12, %v212_v11  ;;  %v1804_v33 = vld [vmem:[#allocation6 + $0xb0] sm:$0xff]   ;;  %v1810_v38 = vld [vmem:[#allocation6 + $0xe0] sm:$0xff]   ;;  %v1811_v39 = vld [vmem:[#allocation6 + $0xe8] sm:$0xff]  }
  0x62   : > { %1523 = vmatprep.subr.bf16.mxu0 %v1990_v0  ;;  %v439_v35 = vld [vmem:[#allocation2 + $0x2] sm:$0xff]  ;;  %v440_v36 = vld [vmem:[#allocation2 + $0xa] sm:$0xff]  ;;  %v1830_v42 = vld [vmem:[#allocation6 + $0x180] sm:$0xff]   ;;  %p1922_p7 = pnand %p1921_p3, %p1915_p8 }
  0x63   : > { %1582 = vmatpush3.bf16.msra.mxu1 %v1808_v17  ;;  %v441_v37 = vpack.c.bf16 %v440_v36, %v439_v35  ;;  %v1812_v40 = vld [vmem:[#allocation6 + $0xf0] sm:$0xff]   ;;  %v1813_v41 = vld [vmem:[#allocation6 + $0xf8] sm:$0xff]   ;;  %v1832_v43 = vld [vmem:[#allocation6 + $0x188] sm:$0xff]  }
  0x64   : > { %1583 = vmatprep.subr.bf16.mxu1 %v1990_v0  ;;  %v1834_v44 = vld [vmem:[#allocation6 + $0x190] sm:$0xff]   ;;  %v1836_v45 = vld [vmem:[#allocation6 + $0x198] sm:$0xff]   ;;  %v1360_v46 = vld [vmem:[%s2333_s2] ss:$0 sm:$0xff] }
  0x65   : > { %1524 = vmatpush3.bf16.msra.mxu0 %v1785_v6  ;;  %v1814_v58 = vld [vmem:[#allocation6 + $0x100] sm:$0xff]   ;;  %v1815_v60 = vld [vmem:[#allocation6 + $0x108] sm:$0xff]   ;;  %v1816_v61 = vld [vmem:[#allocation6 + $0x110] sm:$0xff]  }
  0x66   : > { %1525 = vmatprep.subr.bf16.mxu0 %v1990_v0  ;;  %v1817_v62 = vld [vmem:[#allocation6 + $0x118] sm:$0xff]   ;;  %v1818_v63 = vld [vmem:[#allocation6 + $0x120] sm:$0xff]   ;;  %v1819_v1 = vld [vmem:[#allocation6 + $0x128] sm:$0xff]  }
  0x67   : > { %1584 = vmatpush3.bf16.msra.mxu1 %v1809_v19  ;;  %v1820_v2 = vld [vmem:[#allocation6 + $0x130] sm:$0xff]   ;;  %v1821_v3 = vld [vmem:[#allocation6 + $0x138] sm:$0xff]   ;;  %v1822_v6 = vld [vmem:[#allocation6 + $0x140] sm:$0xff]  }
  0x68   : > { %1585 = vmatprep.subr.bf16.mxu1 %v1990_v0  ;;  %v1827_v11 = vld [vmem:[#allocation6 + $0x168] sm:$0xff]   ;;  %v1828_v12 = vld [vmem:[#allocation6 + $0x170] sm:$0xff]   ;;  %v1829_v13 = vld [vmem:[#allocation6 + $0x178] sm:$0xff]  }
  0x69   : > { %1526 = vmatpush3.bf16.msra.mxu0 %v1786_v7  ;;  %v1823_v7 = vld [vmem:[#allocation6 + $0x148] sm:$0xff]   ;;  %v1835_v19 = vld [vmem:[#allocation6 + $0x1d0] sm:$0xff]  }
  0x6a   : > { %1527 = vmatprep.subr.bf16.mxu0 %v1990_v0 }
  0x6b   : > { %1586 = vmatpush3.bf16.msra.mxu1 %v1810_v38 }
  0x6c   : > { %1587 = vmatprep.subr.bf16.mxu1 %v1990_v0 }
  0x6d   : > { %1528 = vmatpush3.bf16.msra.mxu0 %v1787_v8  ;;  %v1824_v8 = vld [vmem:[#allocation6 + $0x150] sm:$0xff]  }
  0x6e   : > { %1529 = vmatprep.subr.bf16.mxu0 %v1990_v0 }
  0x6f   : > { %1588 = vmatpush3.bf16.msra.mxu1 %v1811_v39 }
  0x70   : > { %1589 = vmatprep.subr.bf16.mxu1 %v1990_v0 }
  0x71   : > { %1530 = vmatpush3.bf16.msra.mxu0 %v1788_v9  ;;  %v1825_v9 = vld [vmem:[#allocation6 + $0x158] sm:$0xff]  }
  0x72   : > { %1531 = vmatprep.subr.bf16.mxu0 %v1990_v0 }
  0x73   : > { %1590 = vmatpush3.bf16.msra.mxu1 %v1812_v40 }
  0x74   : > { %1591 = vmatprep.subr.bf16.mxu1 %v1990_v0 }
  0x75   : > { %1532 = vmatpush3.bf16.msra.mxu0 %v1789_v10  ;;  %v1826_v10 = vld [vmem:[#allocation6 + $0x160] sm:$0xff]  }
  0x76   : > { %1537 = vmatprep.subr.bf16.mxu0 %v1990_v0 }
  0x77   : > { %1592 = vmatpush3.bf16.msra.mxu1 %v1813_v41  ;;  %v1846_v41 = vld [vmem:[#allocation6 + $0x200] sm:$0xff]  }
  0x78   : > { %1534 = vmatmul.mubr.bf16.vlgmr.msra.gmra.mrb[0].mxu0 %v214_v15  ;;  %1597 = vmatprep.subr.bf16.mxu1 %v1990_v0 }
  0x79   : > { %1538 = vmatpush3.bf16.msra.mxu0 %v1790_v16  ;;  %1553 = vmatprep.mubr.msk.bf16.mxu0 %vm1991_vm0, %v1990_v0  ;;  %v1831_v16 = vld [vmem:[#allocation6 + $0x1c0] sm:$0xff]  }
  0x7a   : > { %1539 = vmatprep.subr.bf16.mxu0 %v1990_v0 }
  0x7d   : > { %1540 = vmatpush3.bf16.msra.mxu0 %v1791_v18  ;;  %v1833_v18 = vld [vmem:[#allocation6 + $0x1c8] sm:$0xff]  }
  0x7e   : > { %1541 = vmatprep.subr.bf16.mxu0 %v1990_v0 }
  0x81   : > { %1542 = vmatpush3.bf16.msra.mxu0 %v1792_v20  ;;  %v1837_v20 = vld [vmem:[#allocation6 + $0x1d8] sm:$0xff]  }
  0x82   : > { %1543 = vmatprep.subr.bf16.mxu0 %v1990_v0 }
  0x85   : > { %1544 = vmatpush3.bf16.msra.mxu0 %v1793_v21  ;;  %v1839_v21 = vld [vmem:[#allocation6 + $0x1e0] sm:$0xff]  }
  0x86   : > { %1545 = vmatprep.subr.bf16.mxu0 %v1990_v0 }
  0x89   : > { %1546 = vmatpush3.bf16.msra.mxu0 %v1794_v22  ;;  %v1841_v22 = vld [vmem:[#allocation6 + $0x1e8] sm:$0xff]  }
  0x8a   : > { %1547 = vmatprep.subr.bf16.mxu0 %v1990_v0 }
  0x8d   : > { %1548 = vmatpush3.bf16.msra.mxu0 %v1795_v23  ;;  %v1838_v23 = vld [vmem:[#allocation6 + $0x1a0] sm:$0xff]  }
  0x8e   : > { %1549 = vmatprep.subr.bf16.mxu0 %v1990_v0 }
  0x91   : > { %1550 = vmatpush3.bf16.msra.mxu0 %v1796_v24  ;;  %v1843_v24 = vld [vmem:[#allocation6 + $0x1f0] sm:$0xff]  }
  0x92   : > { %1551 = vmatprep.subr.bf16.mxu0 %v1990_v0 }
  0x95   : > { %1552 = vmatpush3.bf16.msra.mxu0 %v1797_v25  ;;  %v1840_v25 = vld [vmem:[#allocation6 + $0x1a8] sm:$0xff]  }
  0x96   : > { %1557 = vmatprep.subr.bf16.mxu0 %v1990_v0 }
  0x98   : > { %1554 = vmatmul.mubr.bf16.vlgmr.msra.gmra.mrb[0].mxu0 %v330_v26  ;;  %v1845_v26 = vld [vmem:[#allocation6 + $0x1f8] sm:$0xff]  }
  0x99   : > { %1558 = vmatpush3.bf16.msra.mxu0 %v1798_v27  ;;  %1573 = vmatprep.mubr.msk.bf16.mxu0 %vm1991_vm0, %v1990_v0  ;;  %v1842_v27 = vld [vmem:[#allocation6 + $0x1b0] sm:$0xff]  }
  0x9a   : > { %1559 = vmatprep.subr.bf16.mxu0 %v1990_v0 }
  0x9d   : > { %1560 = vmatpush3.bf16.msra.mxu0 %v1799_v28  ;;  %v1844_v28 = vld [vmem:[#allocation6 + $0x1b8] sm:$0xff]  }
  0x9e   : > { %1561 = vmatprep.subr.bf16.mxu0 %v1990_v0 }
  0xa1   : > { %1562 = vmatpush3.bf16.msra.mxu0 %v1800_v29  ;;  %v1386_v29 = vld [vmem:[%s2333_s2 + $0x1] ss:$0 sm:$0xff] }
  0xa2   : > { %1563 = vmatprep.subr.bf16.mxu0 %v1990_v0 }
  0xa5   : > { %1564 = vmatpush3.bf16.msra.mxu0 %v1801_v30 }
  0xa6   : > { %1565 = vmatprep.subr.bf16.mxu0 %v1990_v0 }
  0xa9   : > { %1566 = vmatpush3.bf16.msra.mxu0 %v1802_v31 }
  0xaa   : > { %1567 = vmatprep.subr.bf16.mxu0 %v1990_v0 }
  0xad   : > { %1568 = vmatpush3.bf16.msra.mxu0 %v1803_v32 }
  0xae   : > { %1569 = vmatprep.subr.bf16.mxu0 %v1990_v0 }
  0xb1   : > { %1570 = vmatpush3.bf16.msra.mxu0 %v1804_v33 }
  0xb2   : > { %1571 = vmatprep.subr.bf16.mxu0 %v1990_v0 }
  0xb5   : > { %1572 = vmatpush3.bf16.msra.mxu0 %v1805_v34 }
  0xb6   : > { %1637 = vmatprep.subr.bf16.mxu0 %v1990_v0 }
  0xb8   : > { %1574 = vmatmul.mubr.bf16.vlgmr.msra.gmra.mrb[0].mxu0 %v441_v37 }
  0xb9   : > { %1653 = vmatprep.mubr.msk.bf16.mxu0 %vm1991_vm0, %v1990_v0  ;;  %1638 = vmatpush3.bf16.msra.mxu0 %v1830_v42 }
  0xba   : > { %1639 = vmatprep.subr.bf16.mxu0 %v1990_v0 }
  0xbd   : > { %1640 = vmatpush3.bf16.msra.mxu0 %v1832_v43  ;;  %v1847_v43 = vld [vmem:[#allocation6 + $0x208] sm:$0xff]  }
  0xbe   : > { %1641 = vmatprep.subr.bf16.mxu0 %v1990_v0 }
  0xc1   : > { %1642 = vmatpush3.bf16.msra.mxu0 %v1834_v44  ;;  %v1848_v44 = vld [vmem:[#allocation6 + $0x210] sm:$0xff]  }
  0xc2   : > { %1643 = vmatprep.subr.bf16.mxu0 %v1990_v0 }
  0xc5   : > { %1644 = vmatpush3.bf16.msra.mxu0 %v1836_v45  ;;  %v1849_v45 = vld [vmem:[#allocation6 + $0x218] sm:$0xff]  }
  0xc6   : > { %1645 = vmatprep.subr.bf16.mxu0 %v1990_v0 }
  0xc9   : > { %1646 = vmatpush3.bf16.msra.mxu0 %v1838_v23 }
  0xca   : > { %1647 = vmatprep.subr.bf16.mxu0 %v1990_v0 }
  0xcd   : > { %1648 = vmatpush3.bf16.msra.mxu0 %v1840_v25 }
  0xce   : > { %1649 = vmatprep.subr.bf16.mxu0 %v1990_v0 }
  0xd1   : > { %1650 = vmatpush3.bf16.msra.mxu0 %v1842_v27 }
  0xd2   : > { %1651 = vmatprep.subr.bf16.mxu0 %v1990_v0 }
  0xd5   : > { %1652 = vmatpush3.bf16.msra.mxu0 %v1844_v28 }
  0xd6   : > { %1677 = vmatprep.subr.bf16.mxu0 %v1990_v0 }
 0x18b   : > { %v541_v47 = vpop.f32.mrb[0].mxu0 }
 0x18c   : > { %v1697_v48 = vadd.f32 %v1360_v46, %v541_v47  ;;  %v1575_v49 = vpop.f32.mrb[1].mxu0  ;;  %v1851_v47 = vld [vmem:[#allocation6 + $0x228] sm:$0xff]  }
 0x18d   : > { %v544_v50 = vpop.f32.mrb[2].mxu0  ;;  %v1853_v49 = vld [vmem:[#allocation6 + $0x238] sm:$0xff]  }
 0x18e   : > { %v550_v51 = vmax.f32 %v1697_v48, 0.0  ;;  %v1698_v52 = vadd.f32 %v1360_v46, %v544_v50  ;;  %v1576_v53 = vpop.f32.mrb[3].mxu0  ;;  %v1850_v46 = vld [vmem:[#allocation6 + $0x220] sm:$0xff]   ;;  %v1852_v48 = vld [vmem:[#allocation6 + $0x230] sm:$0xff]  }
 0x190   : > { %552 = vst [vmem:[#allocation2 + $0x1] sm:$0xff] %v550_v51  ;;  %v551_v54 = vmax.f32 %v1698_v52, 0.0 }
 0x192   : > { %553 = vst [vmem:[#allocation2 + $0x9] sm:$0xff] %v551_v54  ;;  %v675_v55 = vpack.c.bf16 %v551_v54, %v550_v51 }
 0x197   : > { %v556_v56 = vld [vmem:[#allocation2] sm:$0xff] }
 0x199   : > { %v557_v57 = vld [vmem:[#allocation2 + $0x8] sm:$0xff] }
 0x19a   : > { %v558_v59 = vpack.c.bf16 %v557_v57, %v556_v56  ;;  %v784_v14 = vld [vmem:[#allocation2 + $0x2] sm:$0xff]  ;;  %v785_v15 = vld [vmem:[#allocation2 + $0xa] sm:$0xff] }
 0x19b   : > { %v786_v17 = vpack.c.bf16 %v785_v15, %v784_v14  ;;  %v1412_v57 = vld [vmem:[%s2333_s2 + $0x2] ss:$0 sm:$0xff] }
 0x19c   : > { %1594 = vmatmul.mubr.bf16.vlgmr.msra.gmra.mrb[0].mxu1 %v558_v59 }
 0x19d   : > { %1598 = vmatpush3.bf16.msra.mxu1 %v1814_v58  ;;  %1613 = vmatprep.mubr.msk.bf16.mxu1 %vm1991_vm0, %v1990_v0 }
 0x19e   : > { %1599 = vmatprep.subr.bf16.mxu1 %v1990_v0 }
 0x1a1   : > { %1600 = vmatpush3.bf16.msra.mxu1 %v1815_v60 }
 0x1a2   : > { %1601 = vmatprep.subr.bf16.mxu1 %v1990_v0 }
 0x1a5   : > { %1602 = vmatpush3.bf16.msra.mxu1 %v1816_v61 }
 0x1a6   : > { %1603 = vmatprep.subr.bf16.mxu1 %v1990_v0 }
 0x1a9   : > { %1604 = vmatpush3.bf16.msra.mxu1 %v1817_v62 }
 0x1aa   : > { %1605 = vmatprep.subr.bf16.mxu1 %v1990_v0 }
 0x1ad   : > { %1606 = vmatpush3.bf16.msra.mxu1 %v1818_v63 }
 0x1ae   : > { %1607 = vmatprep.subr.bf16.mxu1 %v1990_v0 }
 0x1b1   : > { %1608 = vmatpush3.bf16.msra.mxu1 %v1819_v1 }
 0x1b2   : > { %1609 = vmatprep.subr.bf16.mxu1 %v1990_v0 }
 0x1b5   : > { %1610 = vmatpush3.bf16.msra.mxu1 %v1820_v2 }
 0x1b6   : > { %1611 = vmatprep.subr.bf16.mxu1 %v1990_v0 }
 0x1b9   : > { %1612 = vmatpush3.bf16.msra.mxu1 %v1821_v3 }
 0x1ba   : > { %1617 = vmatprep.subr.bf16.mxu1 %v1990_v0 }
 0x1bc   : > { %1614 = vmatmul.mubr.bf16.vlgmr.msra.gmra.mrb[0].mxu1 %v675_v55 }
 0x1bd   : > { %1618 = vmatpush3.bf16.msra.mxu1 %v1822_v6  ;;  %1633 = vmatprep.mubr.msk.bf16.mxu1 %vm1991_vm0, %v1990_v0 }
 0x1be   : > { %1619 = vmatprep.subr.bf16.mxu1 %v1990_v0 }
 0x1c1   : > { %1620 = vmatpush3.bf16.msra.mxu1 %v1823_v7 }
 0x1c2   : > { %1621 = vmatprep.subr.bf16.mxu1 %v1990_v0 }
 0x1c5   : > { %1622 = vmatpush3.bf16.msra.mxu1 %v1824_v8 }
 0x1c6   : > { %1623 = vmatprep.subr.bf16.mxu1 %v1990_v0 }
 0x1c9   : > { %1624 = vmatpush3.bf16.msra.mxu1 %v1825_v9 }
 0x1ca   : > { %1625 = vmatprep.subr.bf16.mxu1 %v1990_v0 }
 0x1cd   : > { %1626 = vmatpush3.bf16.msra.mxu1 %v1826_v10 }
 0x1ce   : > { %1627 = vmatprep.subr.bf16.mxu1 %v1990_v0 }
 0x1d1   : > { %1628 = vmatpush3.bf16.msra.mxu1 %v1827_v11 }
 0x1d2   : > { %1629 = vmatprep.subr.bf16.mxu1 %v1990_v0 }
 0x1d5   : > { %1630 = vmatpush3.bf16.msra.mxu1 %v1828_v12 }
 0x1d6   : > { %1631 = vmatprep.subr.bf16.mxu1 %v1990_v0 }
 0x1d9   : > { %1632 = vmatpush3.bf16.msra.mxu1 %v1829_v13 }
 0x1da   : > { %1657 = vmatprep.subr.bf16.mxu1 %v1990_v0 }
 0x1dc   : > { %1634 = vmatmul.mubr.bf16.vlgmr.msra.gmra.mrb[0].mxu1 %v786_v17 }
 0x1dd   : > { %1658 = vmatpush3.bf16.msra.mxu1 %v1831_v16  ;;  %1673 = vmatprep.mubr.msk.bf16.mxu1 %vm1991_vm0, %v1990_v0 }
 0x1de   : > { %1659 = vmatprep.subr.bf16.mxu1 %v1990_v0 }
 0x1e1   : > { %1660 = vmatpush3.bf16.msra.mxu1 %v1833_v18 }
 0x1e2   : > { %1661 = vmatprep.subr.bf16.mxu1 %v1990_v0 }
 0x1e5   : > { %1662 = vmatpush3.bf16.msra.mxu1 %v1835_v19 }
 0x1e6   : > { %1663 = vmatprep.subr.bf16.mxu1 %v1990_v0 }
 0x1e9   : > { %1664 = vmatpush3.bf16.msra.mxu1 %v1837_v20 }
 0x1ea   : > { %1665 = vmatprep.subr.bf16.mxu1 %v1990_v0 }
 0x1ed   : > { %1666 = vmatpush3.bf16.msra.mxu1 %v1839_v21 }
 0x1ee   : > { %1667 = vmatprep.subr.bf16.mxu1 %v1990_v0 }
 0x1f1   : > { %1668 = vmatpush3.bf16.msra.mxu1 %v1841_v22 }
 0x1f2   : > { %1669 = vmatprep.subr.bf16.mxu1 %v1990_v0 }
 0x1f5   : > { %1670 = vmatpush3.bf16.msra.mxu1 %v1843_v24 }
 0x1f6   : > { %1671 = vmatprep.subr.bf16.mxu1 %v1990_v0 }
 0x1f9   : > { %1672 = vmatpush3.bf16.msra.mxu1 %v1845_v26 }
 0x2af   : > { %v886_v30 = vpop.f32.mrb[0].mxu1 }
 0x2b0   : > { %v1699_v31 = vadd.f32 %v1386_v29, %v886_v30  ;;  %v1635_v32 = vpop.f32.mrb[1].mxu1 }
 0x2b1   : > { %v889_v33 = vpop.f32.mrb[2].mxu1 }
 0x2b2   : > { %v895_v34 = vmax.f32 %v1699_v31, 0.0  ;;  %v1700_v35 = vadd.f32 %v1386_v29, %v889_v33  ;;  %v1636_v36 = vpop.f32.mrb[3].mxu1 }
 0x2b4   : > { %897 = vst [vmem:[#allocation2 + $0x1] sm:$0xff] %v895_v34  ;;  %v896_v37 = vmax.f32 %v1700_v35, 0.0 }
 0x2b6   : > { %898 = vst [vmem:[#allocation2 + $0x9] sm:$0xff] %v896_v37  ;;  %v1020_v38 = vpack.c.bf16 %v896_v37, %v895_v34 }
 0x2b8   : > { %1674 = vmatmul.mubr.bf16.vlgmr.msra.gmra.mrb[4].mxu1 %v1020_v38 }
 0x2bb   : > { %v901_v39 = vld [vmem:[#allocation2] sm:$0xff] }
 0x2bd   : > { %v902_v40 = vld [vmem:[#allocation2 + $0x8] sm:$0xff] }
 0x2be   : > { %v903_v42 = vpack.c.bf16 %v902_v40, %v901_v39  ;;  %v1129_v50 = vld [vmem:[#allocation2 + $0x2] sm:$0xff]  ;;  %v1130_v51 = vld [vmem:[#allocation2 + $0xa] sm:$0xff] }
 0x2bf   : > { %v1131_v52 = vpack.c.bf16 %v1130_v51, %v1129_v50 }
 0x2c0   : > { %1654 = vmatmul.mubr.bf16.vlgmr.msra.gmra.mrb[4].mxu0 %v903_v42 }
 0x2c1   : > { %1678 = vmatpush3.bf16.msra.mxu0 %v1846_v41  ;;  %1693 = vmatprep.mubr.msk.bf16.mxu0 %vm1991_vm0, %v1990_v0 }
 0x2c2   : > { %1679 = vmatprep.subr.bf16.mxu0 %v1990_v0 }
 0x2c5   : > { %1680 = vmatpush3.bf16.msra.mxu0 %v1847_v43 }
 0x2c6   : > { %1681 = vmatprep.subr.bf16.mxu0 %v1990_v0 }
 0x2c9   : > { %1682 = vmatpush3.bf16.msra.mxu0 %v1848_v44 }
 0x2ca   : > { %1683 = vmatprep.subr.bf16.mxu0 %v1990_v0 }
 0x2cd   : > { %1684 = vmatpush3.bf16.msra.mxu0 %v1849_v45 }
 0x2ce   : > { %1685 = vmatprep.subr.bf16.mxu0 %v1990_v0 }
 0x2d1   : > { %1686 = vmatpush3.bf16.msra.mxu0 %v1850_v46 }
 0x2d2   : > { %1687 = vmatprep.subr.bf16.mxu0 %v1990_v0 }
 0x2d5   : > { %1688 = vmatpush3.bf16.msra.mxu0 %v1851_v47 }
 0x2d6   : > { %1689 = vmatprep.subr.bf16.mxu0 %v1990_v0 }
 0x2d9   : > { %1690 = vmatpush3.bf16.msra.mxu0 %v1852_v48 }
 0x2da   : > { %1691 = vmatprep.subr.bf16.mxu0 %v1990_v0 }
 0x2dd   : > { %1692 = vmatpush3.bf16.msra.mxu0 %v1853_v49 }
 0x2e0   : > { %1694 = vmatmul.mubr.bf16.vlgmr.msra.gmra.mrb[8].mxu0 %v1131_v52 }
 0x38b   : > { %v1120_v53 = vpop.f32.mrb[4].mxu1 }
 0x38c   : > { %v1675_v54 = vpop.f32.mrb[5].mxu1 }
 0x38d   : > { %v1123_v55 = vpop.f32.mrb[6].mxu1 }
 0x38e   : > { %v1676_v56 = vpop.f32.mrb[7].mxu1 }
 0x393   : > { %v1003_v58 = vpop.f32.mrb[4].mxu0 }
 0x394   : > { %v1016_v59 = vadd.f32 %v1412_v57, %v1003_v58  ;;  %v1655_v60 = vpop.f32.mrb[5].mxu0 }
 0x395   : > { %v1006_v61 = vpop.f32.mrb[6].mxu0 }
 0x396   : > { %v1127_v0 = vadd.f32 %v1120_v53, %v1016_v59  ;;  %v1017_v62 = vadd.f32 %v1412_v57, %v1006_v61  ;;  %v1656_v63 = vpop.f32.mrb[7].mxu0 }
 0x398   : > { %v1128_v1 = vadd.f32 %v1123_v55, %v1017_v62 }
 0x3b3   : > { %v1231_v2 = vpop.f32.mrb[8].mxu0 }
 0x3b4   : > { %v1238_v3 = vadd.f32 %v1231_v2, %v1127_v0  ;;  %v1695_v6 = vpop.f32.mrb[9].mxu0 }
 0x3b5   : > { %v1234_v7 = vpop.f32.mrb[10].mxu0 }
 0x3b6   : > { %v1240_v8 = vadd.f32 %v1238_v3, %v2178_v4  ;;  %v1239_v9 = vadd.f32 %v1234_v7, %v1128_v1  ;;  %v1696_v10 = vpop.f32.mrb[11].mxu0 }
 0x3b8   : > { %1242 = vst [vmem:[%s203_s10] sm:$0xff] %v1240_v8  ;;  %v1241_v11 = vadd.f32 %v1239_v9, %v2180_v5 }
 0x3ba   : > { %1243 = vst [vmem:[%s203_s10 + $0x8] sm:$0xff] %v1241_v11 }
 0x3bb   : > { %1925 = shalt.err (!%p1922_p7)
}
 0x3bc   : > { %s1926_s9 = scalar_lea.hbm %s2286_s23, 256  ;;  %s1930_s4 = scalar_lea.hbm %s2334_s3, 512 }
 0x3bd   : > { %p1927_p9 = scmp.ne.s32.totalorder %s2286_s23, %s1926_s9  ;;  %p1931_p5 = scmp.lt.u32.totalorder %s2286_s23, %s2334_s3 }
 0x3be   : > { %p1932_p11 = scmp.lt.u32.totalorder %s1930_s4, %s1926_s9  ;;  %p1934_p4 = scmp.lt.u32.totalorder %s1926_s9, %s2286_s23 }
 0x3bf   : > { %p1928_p2 = pnand %p1927_p9, %p2106_p12 }
 0x3c0   : > { %p1933_p1 = por %p1932_p11, %p1931_p5 }
 0x3c1   : > { %p1929_p0 = pneg %p1928_p2 }
 0x3c2   : > { %p1935_p6 = por %p1934_p4, %p1933_p1 }
 0x3c4   : > { %p1936_p8 = pnand %p1935_p6, %p1929_p0 }
 0x3c6   : > { %1939 = shalt.err (!%p1936_p8)
}
 0x3c7   : > { %s1993_s5 = smov 128   ;;  %s1994_s10 = smov 8  }
 0x3c8   : > { %1723 = dma.vmem_to_hbm [thread:$0]  (%p2106_p12), %s2281_s11, 256, %s2286_s23, %s1245_s16, %s1993_s5, %s1993_s5, %s1994_s10  }
 0x3c9 PF: > { %s1273_s27 = sand.u32 1, %s1970_s12   ;;  %p2349_p10 = scmp.ne.s32.totalorder %s2339_s19, 0 }
 0x3ca   : > { %p2350_p13 = scmp.ge.s32.totalorder %s1982_s15, 2  ;;  %s1274_s28 = scalar_lea.sflag [#allocation5], %s1273_s27 }
 0x3cc   : > { %p1734_p3 = pnand %p2350_p13, %p2349_p10 }
 0x3ce   : > { %1965 = dma.done.wait (!%p1734_p3), %s1274_s28, 256  }
 0x3cf   : > { %1967 = vsyncadd (!%p1734_p3), %s1274_s28, 4294967040  ;;  %p17_p7 = scmp.ge.s32.totalorder %s2071_s24, 4   ;;  %s2351_s12 = smov %s1974_s13 }
 0x3d0   : > { %s2352_s13 = smov %s1978_s14  ;;  %s2353_s14 = smov %s2102_s17 }
 0x3d1   : > { %s2354_s15 = smov %s2071_s24  ;;  %19 = sbr.rel (!%p17_p7) target bundleno = 6 (0x6), region = 91 }
 0x3d8   :  { %1279 = vsyncpa [#allocation4], 1 }
 0x3d9   :  { %1281 = vsyncpa [#allocation4 + $0x1], 1 }
 0x3da   :  { %1282 = vsyncpa [#allocation7], 1 }
 0x3db   :  { %1283 = vsyncpa [#allocation5], 1 }
 0x3dc   :  { %1285 = vsyncpa [#allocation5 + $0x1], 1 }

</bundles_post_ra>
